<compile_context>
chip_gen: v7x
topology: tpu7x:2x2x1
jax: 0.10.0
libtpu: 0.0.40
codegen_flags: <defaults>
</compile_context>

<pallas_src>
import functools

import jax
import jax.numpy as jnp
from jax.experimental import pallas as pl
from jax.experimental.pallas import tpu as pltpu


def _rail_fused_kernel(x_ref, t_ref, w_ref, b_ref,
                       cls_ref, ogx_ref, ogy_ref, tgx_ref, tgy_ref,
                       xpad_ref, gpad_ref, *, H, W, Cin, Cout):
    # x_ref   : (1, Cin, H, W)   images tile              (VMEM)
    # t_ref   : (1, 1, H, W)     target tile              (VMEM)
    # w_ref   : (Cout*Cin*9,)    flattened conv weights   (SMEM)
    # b_ref   : (Cout,)          conv bias                (SMEM)
    # cls_ref : (1, Cout, H, W)  out_cls
    # ogx/ogy : (1, 1, H, W)     gradients of out_cls[:,1:2]
    # tgx/tgy : (1, 1, H, W)     gradients of target
    # xpad_ref: (Cin, H+2, W+2)  VMEM scratch, zero-padded input (pad=1)
    # gpad_ref: (2,   H+4, W+4)  VMEM scratch, zero-padded fg map / target (pad=2)
    f32 = jnp.float32

    # ---- in-kernel zero padding (no HBM-side jnp.pad round trips) --------
    xpad_ref[...] = jnp.zeros_like(xpad_ref)
    gpad_ref[...] = jnp.zeros_like(gpad_ref)
    for ci in range(Cin):
        xpad_ref[ci, 1:H + 1, 1:W + 1] = x_ref[0, ci].astype(f32)
    gpad_ref[1, 2:H + 2, 2:W + 2] = t_ref[0, 0].astype(f32)

    # ---- generator: 3x3 "same" conv, Cin -> Cout (VPU shift-and-accumulate)
    # Pre-load all SMEM scalars so the scalar->vector broadcasts can co-issue
    # with the tap FMAs.
    wv = [[[[w_ref[((co * Cin + ci) * 3 + ky) * 3 + kx]
             for kx in range(3)] for ky in range(3)]
           for ci in range(Cin)] for co in range(Cout)]
    accs = [jnp.zeros((H, W), f32) + b_ref[co] for co in range(Cout)]

    for ci in range(Cin):
        xp = xpad_ref[ci]                               # (H+2, W+2)
        cols = [xp[:, kx:kx + W] for kx in range(3)]    # hoisted lane shifts
        for ky in range(3):
            rows = [cols[kx][ky:ky + H, :] for kx in range(3)]
            for co in range(Cout):
                w_co = wv[co][ci][ky]
                for kx in range(3):
                    accs[co] = accs[co] + w_co[kx] * rows[kx]

    for co in range(Cout):
        cls_ref[0, co] = accs[co]
    # Foreground-class map (out_cls[:, 1:2]) goes straight into the padded
    # gradient scratch: fuses generator + gradient, no HBM slice copy.
    gpad_ref[0, 2:H + 2, 2:W + 2] = accs[1]

    # ---- gauss_gradxy for both maps (fg map, target) in one pass ----------
    # Separable factorizations:
    #   Gaussian 3x3 = (1,2,1)/4 (vert) x (1,2,1)/4 (horiz)
    #   Sobel-x      = (1,2,1)^T (vert) x (-1,0,1) (horiz)
    #   Sobel-y      = (-1,0,1)^T (vert) x (1,2,1) (horiz)
    r = jax.lax.broadcasted_iota(jnp.int32, (H + 2, W + 2), 0)
    c = jax.lax.broadcasted_iota(jnp.int32, (H + 2, W + 2), 1)
    interior = (r >= 1) & (r <= H) & (c >= 1) & (c <= W)

    outs = ((ogx_ref, ogy_ref), (tgx_ref, tgy_ref))
    for m in range(2):
        xp = gpad_ref[m]                                # (H+4, W+4), zero ring of 2
        # Gaussian blur (padding=1) on the extended (H+2, W+2) domain.
        bv = 0.25 * (xp[0:H + 2, :] + 2.0 * xp[1:H + 3, :] + xp[2:H + 4, :])
        blur = 0.25 * (bv[:, 0:W + 2] + 2.0 * bv[:, 1:W + 3] + bv[:, 2:W + 4])
        # Zero the outer ring so the Sobel pass sees exact zero-padding of the
        # (H, W) blur (matches F.conv2d(..., padding=1) composition).
        blur = jnp.where(interior, blur, 0.0)
        # Sobel (padding=1): vertical factors first, then horizontal.
        sm_v = blur[0:H, :] + 2.0 * blur[1:H + 1, :] + blur[2:H + 2, :]   # (H, W+2)
        df_v = blur[2:H + 2, :] - blur[0:H, :]                            # (H, W+2)
        gx = sm_v[:, 2:W + 2] - sm_v[:, 0:W]
        gy = df_v[:, 0:W] + 2.0 * df_v[:, 1:W + 1] + df_v[:, 2:W + 2]
        gx_ref, gy_ref = outs[m]
        gx_ref[0, 0] = gx
        gy_ref[0, 0] = gy


def rail_model_forward(images, target, gen_w, gen_b):
    """images: (B, 3, H, W), target: (B, 1, H, W) (already unsqueezed, as in process())."""
    B, Cin, H, W = images.shape
    Cout = gen_w.shape[0]

    kernel = functools.partial(_rail_fused_kernel, H=H, W=W, Cin=Cin, Cout=Cout)
    map4 = lambda b: (b, 0, 0, 0)

    out_shape = (
        jax.ShapeDtypeStruct((B, Cout, H, W), jnp.float32),   # out_cls
        jax.ShapeDtypeStruct((B, 1, H, W), jnp.float32),      # out_gx
        jax.ShapeDtypeStruct((B, 1, H, W), jnp.float32),      # out_gy
        jax.ShapeDtypeStruct((B, 1, H, W), jnp.float32),      # tar_gx
        jax.ShapeDtypeStruct((B, 1, H, W), jnp.float32),      # tar_gy
    )
    out_specs = (
        pl.BlockSpec((1, Cout, H, W), map4),
        pl.BlockSpec((1, 1, H, W), map4),
        pl.BlockSpec((1, 1, H, W), map4),
        pl.BlockSpec((1, 1, H, W), map4),
        pl.BlockSpec((1, 1, H, W), map4),
    )

    return pl.pallas_call(
        kernel,
        out_shape=out_shape,
        grid=(B,),
        in_specs=[
            pl.BlockSpec((1, Cin, H, W), map4),
            pl.BlockSpec((1, 1, H, W), map4),
            pl.BlockSpec(memory_space=pltpu.MemorySpace.SMEM),   # conv weights
            pl.BlockSpec(memory_space=pltpu.MemorySpace.SMEM),   # conv bias
        ],
        out_specs=out_specs,
        scratch_shapes=[
            pltpu.VMEM((Cin, H + 2, W + 2), jnp.float32),   # padded images (pad=1)
            pltpu.VMEM((2, H + 4, W + 4), jnp.float32),     # padded fg map / target (pad=2)
        ],
        compiler_params=pltpu.CompilerParams(dimension_semantics=("parallel",)),
    )(images.astype(jnp.float32), target.astype(jnp.float32),
      gen_w.reshape(-1).astype(jnp.float32), gen_b.astype(jnp.float32))


if __name__ == "__main__":
    key = jax.random.PRNGKey(0)
    k_img, k_tar, k_w, k_b = jax.random.split(key, 4)

    B, Cin, H, W = 2, 3, 16, 16
    numclass = 2

    images = jax.random.normal(k_img, (B, Cin, H, W), dtype=jnp.float32)
    target = jax.random.uniform(k_tar, (B, 1, H, W), dtype=jnp.float32)

    # Deterministic synthetic generator parameters (single 3x3 conv, 3 -> 2 ch).
    gen_w = 0.1 * jax.random.normal(k_w, (numclass, Cin, 3, 3), dtype=jnp.float32)
    gen_b = 0.01 * jax.random.normal(k_b, (numclass,), dtype=jnp.float32)

    outs = jax.jit(rail_model_forward)(images, target, gen_w, gen_b)
    jax.block_until_ready(outs)

    out_cls, out_gx, out_gy, tar_gx, tar_gy = outs
    assert out_cls.shape == (B, numclass, H, W)
    assert out_gx.shape == out_gy.shape == tar_gx.shape == tar_gy.shape == (B, 1, H, W)
    print("KERNEL_OK")
</pallas_src>

<mosaic_0001>
module attributes {stable_mosaic.version = 11 : i64} {
  func.func @_rail_fused_kernel(%arg0: i32, %arg1: memref<1x3x16x16xf32, #tpu.memory_space<vmem>>, %arg2: memref<1x1x16x16xf32, #tpu.memory_space<vmem>>, %arg3: memref<54xf32, #tpu.memory_space<smem>>, %arg4: memref<2xf32, #tpu.memory_space<smem>>, %arg5: memref<1x2x16x16xf32, #tpu.memory_space<vmem>>, %arg6: memref<1x1x16x16xf32, #tpu.memory_space<vmem>>, %arg7: memref<1x1x16x16xf32, #tpu.memory_space<vmem>>, %arg8: memref<1x1x16x16xf32, #tpu.memory_space<vmem>>, %arg9: memref<1x1x16x16xf32, #tpu.memory_space<vmem>>, %arg10: memref<3x18x18xf32, #tpu.memory_space<vmem>>, %arg11: memref<2x20x20xf32, #tpu.memory_space<vmem>>) attributes {dimension_semantics = [#tpu.dimension_semantics<parallel>], iteration_bounds = array<i64: 2>, scalar_prefetch = 0 : i64, scratch_operands = 2 : i64, tpu.core_type = #tpu.core_type<tc>, window_params = [{transform_indices = @transform_0, window_bounds = array<i64: 1, 3, 16, 16>}, {transform_indices = @transform_1, window_bounds = array<i64: 1, 1, 16, 16>}, {transform_indices = @transform_2, window_bounds = array<i64: 54>}, {transform_indices = @transform_3, window_bounds = array<i64: 2>}, {transform_indices = @transform_4, window_bounds = array<i64: 1, 2, 16, 16>}, {transform_indices = @transform_5, window_bounds = array<i64: 1, 1, 16, 16>}, {transform_indices = @transform_6, window_bounds = array<i64: 1, 1, 16, 16>}, {transform_indices = @transform_7, window_bounds = array<i64: 1, 1, 16, 16>}, {transform_indices = @transform_8, window_bounds = array<i64: 1, 1, 16, 16>}]} {
    %cst = arith.constant 0.000000e+00 : f32
    %0 = vector.broadcast %cst : f32 to vector<3x18x18xf32>
    %c0 = arith.constant 0 : index
    %c0_0 = arith.constant 0 : index
    %c0_1 = arith.constant 0 : index
    %1 = vector.load %arg10[%c0, %c0_0, %c0_1] : memref<3x18x18xf32, #tpu.memory_space<vmem>>, vector<3x18x18xf32>
    tpu.vector_store %arg10[%c0, %c0_0, %c0_1], %0 {strides = array<i32>} : memref<3x18x18xf32, #tpu.memory_space<vmem>>, vector<3x18x18xf32>,
    %cst_2 = arith.constant 0.000000e+00 : f32
    %2 = vector.broadcast %cst_2 : f32 to vector<2x20x20xf32>
    %c0_3 = arith.constant 0 : index
    %c0_4 = arith.constant 0 : index
    %c0_5 = arith.constant 0 : index
    %3 = vector.load %arg11[%c0_3, %c0_4, %c0_5] : memref<2x20x20xf32, #tpu.memory_space<vmem>>, vector<2x20x20xf32>
    tpu.vector_store %arg11[%c0_3, %c0_4, %c0_5], %2 {strides = array<i32>} : memref<2x20x20xf32, #tpu.memory_space<vmem>>, vector<2x20x20xf32>,
    %c0_6 = arith.constant 0 : index
    %c0_7 = arith.constant 0 : index
    %c0_8 = arith.constant 0 : index
    %c0_9 = arith.constant 0 : index
    %4 = vector.load %arg1[%c0_6, %c0_7, %c0_8, %c0_9] : memref<1x3x16x16xf32, #tpu.memory_space<vmem>>, vector<1x1x16x16xf32>
    %5 = vector.shape_cast %4 : vector<1x1x16x16xf32> to vector<16x16xf32>
    %c0_10 = arith.constant 0 : index
    %c1 = arith.constant 1 : index
    %c1_11 = arith.constant 1 : index
    %6 = vector.load %arg10[%c0_10, %c1, %c1_11] : memref<3x18x18xf32, #tpu.memory_space<vmem>>, vector<1x16x16xf32>
    %7 = vector.shape_cast %6 : vector<1x16x16xf32> to vector<16x16xf32>
    %8 = vector.shape_cast %5 : vector<16x16xf32> to vector<1x16x16xf32>
    tpu.vector_store %arg10[%c0_10, %c1, %c1_11], %8 {strides = array<i32>} : memref<3x18x18xf32, #tpu.memory_space<vmem>>, vector<1x16x16xf32>,
    %c0_12 = arith.constant 0 : index
    %c1_13 = arith.constant 1 : index
    %c0_14 = arith.constant 0 : index
    %c0_15 = arith.constant 0 : index
    %9 = vector.load %arg1[%c0_12, %c1_13, %c0_14, %c0_15] : memref<1x3x16x16xf32, #tpu.memory_space<vmem>>, vector<1x1x16x16xf32>
    %10 = vector.shape_cast %9 : vector<1x1x16x16xf32> to vector<16x16xf32>
    %c1_16 = arith.constant 1 : index
    %c1_17 = arith.constant 1 : index
    %c1_18 = arith.constant 1 : index
    %11 = vector.load %arg10[%c1_16, %c1_17, %c1_18] : memref<3x18x18xf32, #tpu.memory_space<vmem>>, vector<1x16x16xf32>
    %12 = vector.shape_cast %11 : vector<1x16x16xf32> to vector<16x16xf32>
    %13 = vector.shape_cast %10 : vector<16x16xf32> to vector<1x16x16xf32>
    tpu.vector_store %arg10[%c1_16, %c1_17, %c1_18], %13 {strides = array<i32>} : memref<3x18x18xf32, #tpu.memory_space<vmem>>, vector<1x16x16xf32>,
    %c0_19 = arith.constant 0 : index
    %c2 = arith.constant 2 : index
    %c0_20 = arith.constant 0 : index
    %c0_21 = arith.constant 0 : index
    %14 = vector.load %arg1[%c0_19, %c2, %c0_20, %c0_21] : memref<1x3x16x16xf32, #tpu.memory_space<vmem>>, vector<1x1x16x16xf32>
    %15 = vector.shape_cast %14 : vector<1x1x16x16xf32> to vector<16x16xf32>
    %c2_22 = arith.constant 2 : index
    %c1_23 = arith.constant 1 : index
    %c1_24 = arith.constant 1 : index
    %16 = vector.load %arg10[%c2_22, %c1_23, %c1_24] : memref<3x18x18xf32, #tpu.memory_space<vmem>>, vector<1x16x16xf32>
    %17 = vector.shape_cast %16 : vector<1x16x16xf32> to vector<16x16xf32>
    %18 = vector.shape_cast %15 : vector<16x16xf32> to vector<1x16x16xf32>
    tpu.vector_store %arg10[%c2_22, %c1_23, %c1_24], %18 {strides = array<i32>} : memref<3x18x18xf32, #tpu.memory_space<vmem>>, vector<1x16x16xf32>,
    %c0_25 = arith.constant 0 : index
    %c0_26 = arith.constant 0 : index
    %c0_27 = arith.constant 0 : index
    %c0_28 = arith.constant 0 : index
    %19 = vector.load %arg2[%c0_25, %c0_26, %c0_27, %c0_28] : memref<1x1x16x16xf32, #tpu.memory_space<vmem>>, vector<1x1x16x16xf32>
    %20 = vector.shape_cast %19 : vector<1x1x16x16xf32> to vector<16x16xf32>
    %c1_29 = arith.constant 1 : index
    %c2_30 = arith.constant 2 : index
    %c2_31 = arith.constant 2 : index
    %21 = vector.load %arg11[%c1_29, %c2_30, %c2_31] : memref<2x20x20xf32, #tpu.memory_space<vmem>>, vector<1x16x16xf32>
    %22 = vector.shape_cast %21 : vector<1x16x16xf32> to vector<16x16xf32>
    %23 = vector.shape_cast %20 : vector<16x16xf32> to vector<1x16x16xf32>
    tpu.vector_store %arg11[%c1_29, %c2_30, %c2_31], %23 {strides = array<i32>} : memref<2x20x20xf32, #tpu.memory_space<vmem>>, vector<1x16x16xf32>,
    %c0_32 = arith.constant 0 : index
    %24 = memref.load %arg3[%c0_32] : memref<54xf32, #tpu.memory_space<smem>>
    %c1_33 = arith.constant 1 : index
    %25 = memref.load %arg3[%c1_33] : memref<54xf32, #tpu.memory_space<smem>>
    %c2_34 = arith.constant 2 : index
    %26 = memref.load %arg3[%c2_34] : memref<54xf32, #tpu.memory_space<smem>>
    %c3 = arith.constant 3 : index
    %27 = memref.load %arg3[%c3] : memref<54xf32, #tpu.memory_space<smem>>
    %c4 = arith.constant 4 : index
    %28 = memref.load %arg3[%c4] : memref<54xf32, #tpu.memory_space<smem>>
    %c5 = arith.constant 5 : index
    %29 = memref.load %arg3[%c5] : memref<54xf32, #tpu.memory_space<smem>>
    %c6 = arith.constant 6 : index
    %30 = memref.load %arg3[%c6] : memref<54xf32, #tpu.memory_space<smem>>
    %c7 = arith.constant 7 : index
    %31 = memref.load %arg3[%c7] : memref<54xf32, #tpu.memory_space<smem>>
    %c8 = arith.constant 8 : index
    %32 = memref.load %arg3[%c8] : memref<54xf32, #tpu.memory_space<smem>>
    %c9 = arith.constant 9 : index
    %33 = memref.load %arg3[%c9] : memref<54xf32, #tpu.memory_space<smem>>
    %c10 = arith.constant 10 : index
    %34 = memref.load %arg3[%c10] : memref<54xf32, #tpu.memory_space<smem>>
    %c11 = arith.constant 11 : index
    %35 = memref.load %arg3[%c11] : memref<54xf32, #tpu.memory_space<smem>>
    %c12 = arith.constant 12 : index
    %36 = memref.load %arg3[%c12] : memref<54xf32, #tpu.memory_space<smem>>
    %c13 = arith.constant 13 : index
    %37 = memref.load %arg3[%c13] : memref<54xf32, #tpu.memory_space<smem>>
    %c14 = arith.constant 14 : index
    %38 = memref.load %arg3[%c14] : memref<54xf32, #tpu.memory_space<smem>>
    %c15 = arith.constant 15 : index
    %39 = memref.load %arg3[%c15] : memref<54xf32, #tpu.memory_space<smem>>
    %c16 = arith.constant 16 : index
    %40 = memref.load %arg3[%c16] : memref<54xf32, #tpu.memory_space<smem>>
    %c17 = arith.constant 17 : index
    %41 = memref.load %arg3[%c17] : memref<54xf32, #tpu.memory_space<smem>>
    %c18 = arith.constant 18 : index
    %42 = memref.load %arg3[%c18] : memref<54xf32, #tpu.memory_space<smem>>
    %c19 = arith.constant 19 : index
    %43 = memref.load %arg3[%c19] : memref<54xf32, #tpu.memory_space<smem>>
    %c20 = arith.constant 20 : index
    %44 = memref.load %arg3[%c20] : memref<54xf32, #tpu.memory_space<smem>>
    %c21 = arith.constant 21 : index
    %45 = memref.load %arg3[%c21] : memref<54xf32, #tpu.memory_space<smem>>
    %c22 = arith.constant 22 : index
    %46 = memref.load %arg3[%c22] : memref<54xf32, #tpu.memory_space<smem>>
    %c23 = arith.constant 23 : index
    %47 = memref.load %arg3[%c23] : memref<54xf32, #tpu.memory_space<smem>>
    %c24 = arith.constant 24 : index
    %48 = memref.load %arg3[%c24] : memref<54xf32, #tpu.memory_space<smem>>
    %c25 = arith.constant 25 : index
    %49 = memref.load %arg3[%c25] : memref<54xf32, #tpu.memory_space<smem>>
    %c26 = arith.constant 26 : index
    %50 = memref.load %arg3[%c26] : memref<54xf32, #tpu.memory_space<smem>>
    %c27 = arith.constant 27 : index
    %51 = memref.load %arg3[%c27] : memref<54xf32, #tpu.memory_space<smem>>
    %c28 = arith.constant 28 : index
    %52 = memref.load %arg3[%c28] : memref<54xf32, #tpu.memory_space<smem>>
    %c29 = arith.constant 29 : index
    %53 = memref.load %arg3[%c29] : memref<54xf32, #tpu.memory_space<smem>>
    %c30 = arith.constant 30 : index
    %54 = memref.load %arg3[%c30] : memref<54xf32, #tpu.memory_space<smem>>
    %c31 = arith.constant 31 : index
    %55 = memref.load %arg3[%c31] : memref<54xf32, #tpu.memory_space<smem>>
    %c32 = arith.constant 32 : index
    %56 = memref.load %arg3[%c32] : memref<54xf32, #tpu.memory_space<smem>>
    %c33 = arith.constant 33 : index
    %57 = memref.load %arg3[%c33] : memref<54xf32, #tpu.memory_space<smem>>
    %c34 = arith.constant 34 : index
    %58 = memref.load %arg3[%c34] : memref<54xf32, #tpu.memory_space<smem>>
    %c35 = arith.constant 35 : index
    %59 = memref.load %arg3[%c35] : memref<54xf32, #tpu.memory_space<smem>>
    %c36 = arith.constant 36 : index
    %60 = memref.load %arg3[%c36] : memref<54xf32, #tpu.memory_space<smem>>
    %c37 = arith.constant 37 : index
    %61 = memref.load %arg3[%c37] : memref<54xf32, #tpu.memory_space<smem>>
    %c38 = arith.constant 38 : index
    %62 = memref.load %arg3[%c38] : memref<54xf32, #tpu.memory_space<smem>>
    %c39 = arith.constant 39 : index
    %63 = memref.load %arg3[%c39] : memref<54xf32, #tpu.memory_space<smem>>
    %c40 = arith.constant 40 : index
    %64 = memref.load %arg3[%c40] : memref<54xf32, #tpu.memory_space<smem>>
    %c41 = arith.constant 41 : index
    %65 = memref.load %arg3[%c41] : memref<54xf32, #tpu.memory_space<smem>>
    %c42 = arith.constant 42 : index
    %66 = memref.load %arg3[%c42] : memref<54xf32, #tpu.memory_space<smem>>
    %c43 = arith.constant 43 : index
    %67 = memref.load %arg3[%c43] : memref<54xf32, #tpu.memory_space<smem>>
    %c44 = arith.constant 44 : index
    %68 = memref.load %arg3[%c44] : memref<54xf32, #tpu.memory_space<smem>>
    %c45 = arith.constant 45 : index
    %69 = memref.load %arg3[%c45] : memref<54xf32, #tpu.memory_space<smem>>
    %c46 = arith.constant 46 : index
    %70 = memref.load %arg3[%c46] : memref<54xf32, #tpu.memory_space<smem>>
    %c47 = arith.constant 47 : index
    %71 = memref.load %arg3[%c47] : memref<54xf32, #tpu.memory_space<smem>>
    %c48 = arith.constant 48 : index
    %72 = memref.load %arg3[%c48] : memref<54xf32, #tpu.memory_space<smem>>
    %c49 = arith.constant 49 : index
    %73 = memref.load %arg3[%c49] : memref<54xf32, #tpu.memory_space<smem>>
    %c50 = arith.constant 50 : index
    %74 = memref.load %arg3[%c50] : memref<54xf32, #tpu.memory_space<smem>>
    %c51 = arith.constant 51 : index
    %75 = memref.load %arg3[%c51] : memref<54xf32, #tpu.memory_space<smem>>
    %c52 = arith.constant 52 : index
    %76 = memref.load %arg3[%c52] : memref<54xf32, #tpu.memory_space<smem>>
    %c53 = arith.constant 53 : index
    %77 = memref.load %arg3[%c53] : memref<54xf32, #tpu.memory_space<smem>>
    %cst_35 = arith.constant 0.000000e+00 : f32
    %78 = vector.broadcast %cst_35 : f32 to vector<16x16xf32>
    %c0_36 = arith.constant 0 : index
    %79 = memref.load %arg4[%c0_36] : memref<2xf32, #tpu.memory_space<smem>>
    %80 = vector.broadcast %79 : f32 to vector<16x16xf32>
    %81 = arith.addf %78, %80 : vector<16x16xf32>
    %cst_37 = arith.constant 0.000000e+00 : f32
    %82 = vector.broadcast %cst_37 : f32 to vector<16x16xf32>
    %c1_38 = arith.constant 1 : index
    %83 = memref.load %arg4[%c1_38] : memref<2xf32, #tpu.memory_space<smem>>
    %84 = vector.broadcast %83 : f32 to vector<16x16xf32>
    %85 = arith.addf %82, %84 : vector<16x16xf32>
    %c0_39 = arith.constant 0 : index
    %c0_40 = arith.constant 0 : index
    %c0_41 = arith.constant 0 : index
    %86 = vector.load %arg10[%c0_39, %c0_40, %c0_41] : memref<3x18x18xf32, #tpu.memory_space<vmem>>, vector<1x18x18xf32>
    %87 = vector.shape_cast %86 : vector<1x18x18xf32> to vector<18x18xf32>
    %88 = vector.extract_strided_slice %87 {offsets = [0, 0], sizes = [18, 16], strides = [1, 1]} : vector<18x18xf32> to vector<18x16xf32>
    %89 = vector.extract_strided_slice %87 {offsets = [0, 1], sizes = [18, 16], strides = [1, 1]} : vector<18x18xf32> to vector<18x16xf32>
    %90 = vector.extract_strided_slice %87 {offsets = [0, 2], sizes = [18, 16], strides = [1, 1]} : vector<18x18xf32> to vector<18x16xf32>
    %91 = vector.extract_strided_slice %88 {offsets = [0, 0], sizes = [16, 16], strides = [1, 1]} : vector<18x16xf32> to vector<16x16xf32>
    %92 = vector.extract_strided_slice %89 {offsets = [0, 0], sizes = [16, 16], strides = [1, 1]} : vector<18x16xf32> to vector<16x16xf32>
    %93 = vector.extract_strided_slice %90 {offsets = [0, 0], sizes = [16, 16], strides = [1, 1]} : vector<18x16xf32> to vector<16x16xf32>
    %94 = vector.broadcast %24 : f32 to vector<16x16xf32>
    %95 = arith.mulf %94, %91 : vector<16x16xf32>
    %96 = arith.addf %81, %95 : vector<16x16xf32>
    %97 = vector.broadcast %25 : f32 to vector<16x16xf32>
    %98 = arith.mulf %97, %92 : vector<16x16xf32>
    %99 = arith.addf %96, %98 : vector<16x16xf32>
    %100 = vector.broadcast %26 : f32 to vector<16x16xf32>
    %101 = arith.mulf %100, %93 : vector<16x16xf32>
    %102 = arith.addf %99, %101 : vector<16x16xf32>
    %103 = vector.broadcast %51 : f32 to vector<16x16xf32>
    %104 = arith.mulf %103, %91 : vector<16x16xf32>
    %105 = arith.addf %85, %104 : vector<16x16xf32>
    %106 = vector.broadcast %52 : f32 to vector<16x16xf32>
    %107 = arith.mulf %106, %92 : vector<16x16xf32>
    %108 = arith.addf %105, %107 : vector<16x16xf32>
    %109 = vector.broadcast %53 : f32 to vector<16x16xf32>
    %110 = arith.mulf %109, %93 : vector<16x16xf32>
    %111 = arith.addf %108, %110 : vector<16x16xf32>
    %112 = vector.extract_strided_slice %88 {offsets = [1, 0], sizes = [16, 16], strides = [1, 1]} : vector<18x16xf32> to vector<16x16xf32>
    %113 = vector.extract_strided_slice %89 {offsets = [1, 0], sizes = [16, 16], strides = [1, 1]} : vector<18x16xf32> to vector<16x16xf32>
    %114 = vector.extract_strided_slice %90 {offsets = [1, 0], sizes = [16, 16], strides = [1, 1]} : vector<18x16xf32> to vector<16x16xf32>
    %115 = vector.broadcast %27 : f32 to vector<16x16xf32>
    %116 = arith.mulf %115, %112 : vector<16x16xf32>
    %117 = arith.addf %102, %116 : vector<16x16xf32>
    %118 = vector.broadcast %28 : f32 to vector<16x16xf32>
    %119 = arith.mulf %118, %113 : vector<16x16xf32>
    %120 = arith.addf %117, %119 : vector<16x16xf32>
    %121 = vector.broadcast %29 : f32 to vector<16x16xf32>
    %122 = arith.mulf %121, %114 : vector<16x16xf32>
    %123 = arith.addf %120, %122 : vector<16x16xf32>
    %124 = vector.broadcast %54 : f32 to vector<16x16xf32>
    %125 = arith.mulf %124, %112 : vector<16x16xf32>
    %126 = arith.addf %111, %125 : vector<16x16xf32>
    %127 = vector.broadcast %55 : f32 to vector<16x16xf32>
    %128 = arith.mulf %127, %113 : vector<16x16xf32>
    %129 = arith.addf %126, %128 : vector<16x16xf32>
    %130 = vector.broadcast %56 : f32 to vector<16x16xf32>
    %131 = arith.mulf %130, %114 : vector<16x16xf32>
    %132 = arith.addf %129, %131 : vector<16x16xf32>
    %133 = vector.extract_strided_slice %88 {offsets = [2, 0], sizes = [16, 16], strides = [1, 1]} : vector<18x16xf32> to vector<16x16xf32>
    %134 = vector.extract_strided_slice %89 {offsets = [2, 0], sizes = [16, 16], strides = [1, 1]} : vector<18x16xf32> to vector<16x16xf32>
    %135 = vector.extract_strided_slice %90 {offsets = [2, 0], sizes = [16, 16], strides = [1, 1]} : vector<18x16xf32> to vector<16x16xf32>
    %136 = vector.broadcast %30 : f32 to vector<16x16xf32>
    %137 = arith.mulf %136, %133 : vector<16x16xf32>
    %138 = arith.addf %123, %137 : vector<16x16xf32>
    %139 = vector.broadcast %31 : f32 to vector<16x16xf32>
    %140 = arith.mulf %139, %134 : vector<16x16xf32>
    %141 = arith.addf %138, %140 : vector<16x16xf32>
    %142 = vector.broadcast %32 : f32 to vector<16x16xf32>
    %143 = arith.mulf %142, %135 : vector<16x16xf32>
    %144 = arith.addf %141, %143 : vector<16x16xf32>
    %145 = vector.broadcast %57 : f32 to vector<16x16xf32>
    %146 = arith.mulf %145, %133 : vector<16x16xf32>
    %147 = arith.addf %132, %146 : vector<16x16xf32>
    %148 = vector.broadcast %58 : f32 to vector<16x16xf32>
    %149 = arith.mulf %148, %134 : vector<16x16xf32>
    %150 = arith.addf %147, %149 : vector<16x16xf32>
    %151 = vector.broadcast %59 : f32 to vector<16x16xf32>
    %152 = arith.mulf %151, %135 : vector<16x16xf32>
    %153 = arith.addf %150, %152 : vector<16x16xf32>
    %c1_42 = arith.constant 1 : index
    %c0_43 = arith.constant 0 : index
    %c0_44 = arith.constant 0 : index
    %154 = vector.load %arg10[%c1_42, %c0_43, %c0_44] : memref<3x18x18xf32, #tpu.memory_space<vmem>>, vector<1x18x18xf32>
    %155 = vector.shape_cast %154 : vector<1x18x18xf32> to vector<18x18xf32>
    %156 = vector.extract_strided_slice %155 {offsets = [0, 0], sizes = [18, 16], strides = [1, 1]} : vector<18x18xf32> to vector<18x16xf32>
    %157 = vector.extract_strided_slice %155 {offsets = [0, 1], sizes = [18, 16], strides = [1, 1]} : vector<18x18xf32> to vector<18x16xf32>
    %158 = vector.extract_strided_slice %155 {offsets = [0, 2], sizes = [18, 16], strides = [1, 1]} : vector<18x18xf32> to vector<18x16xf32>
    %159 = vector.extract_strided_slice %156 {offsets = [0, 0], sizes = [16, 16], strides = [1, 1]} : vector<18x16xf32> to vector<16x16xf32>
    %160 = vector.extract_strided_slice %157 {offsets = [0, 0], sizes = [16, 16], strides = [1, 1]} : vector<18x16xf32> to vector<16x16xf32>
    %161 = vector.extract_strided_slice %158 {offsets = [0, 0], sizes = [16, 16], strides = [1, 1]} : vector<18x16xf32> to vector<16x16xf32>
    %162 = vector.broadcast %33 : f32 to vector<16x16xf32>
    %163 = arith.mulf %162, %159 : vector<16x16xf32>
    %164 = arith.addf %144, %163 : vector<16x16xf32>
    %165 = vector.broadcast %34 : f32 to vector<16x16xf32>
    %166 = arith.mulf %165, %160 : vector<16x16xf32>
    %167 = arith.addf %164, %166 : vector<16x16xf32>
    %168 = vector.broadcast %35 : f32 to vector<16x16xf32>
    %169 = arith.mulf %168, %161 : vector<16x16xf32>
    %170 = arith.addf %167, %169 : vector<16x16xf32>
    %171 = vector.broadcast %60 : f32 to vector<16x16xf32>
    %172 = arith.mulf %171, %159 : vector<16x16xf32>
    %173 = arith.addf %153, %172 : vector<16x16xf32>
    %174 = vector.broadcast %61 : f32 to vector<16x16xf32>
    %175 = arith.mulf %174, %160 : vector<16x16xf32>
    %176 = arith.addf %173, %175 : vector<16x16xf32>
    %177 = vector.broadcast %62 : f32 to vector<16x16xf32>
    %178 = arith.mulf %177, %161 : vector<16x16xf32>
    %179 = arith.addf %176, %178 : vector<16x16xf32>
    %180 = vector.extract_strided_slice %156 {offsets = [1, 0], sizes = [16, 16], strides = [1, 1]} : vector<18x16xf32> to vector<16x16xf32>
    %181 = vector.extract_strided_slice %157 {offsets = [1, 0], sizes = [16, 16], strides = [1, 1]} : vector<18x16xf32> to vector<16x16xf32>
    %182 = vector.extract_strided_slice %158 {offsets = [1, 0], sizes = [16, 16], strides = [1, 1]} : vector<18x16xf32> to vector<16x16xf32>
    %183 = vector.broadcast %36 : f32 to vector<16x16xf32>
    %184 = arith.mulf %183, %180 : vector<16x16xf32>
    %185 = arith.addf %170, %184 : vector<16x16xf32>
    %186 = vector.broadcast %37 : f32 to vector<16x16xf32>
    %187 = arith.mulf %186, %181 : vector<16x16xf32>
    %188 = arith.addf %185, %187 : vector<16x16xf32>
    %189 = vector.broadcast %38 : f32 to vector<16x16xf32>
    %190 = arith.mulf %189, %182 : vector<16x16xf32>
    %191 = arith.addf %188, %190 : vector<16x16xf32>
    %192 = vector.broadcast %63 : f32 to vector<16x16xf32>
    %193 = arith.mulf %192, %180 : vector<16x16xf32>
    %194 = arith.addf %179, %193 : vector<16x16xf32>
    %195 = vector.broadcast %64 : f32 to vector<16x16xf32>
    %196 = arith.mulf %195, %181 : vector<16x16xf32>
    %197 = arith.addf %194, %196 : vector<16x16xf32>
    %198 = vector.broadcast %65 : f32 to vector<16x16xf32>
    %199 = arith.mulf %198, %182 : vector<16x16xf32>
    %200 = arith.addf %197, %199 : vector<16x16xf32>
    %201 = vector.extract_strided_slice %156 {offsets = [2, 0], sizes = [16, 16], strides = [1, 1]} : vector<18x16xf32> to vector<16x16xf32>
    %202 = vector.extract_strided_slice %157 {offsets = [2, 0], sizes = [16, 16], strides = [1, 1]} : vector<18x16xf32> to vector<16x16xf32>
    %203 = vector.extract_strided_slice %158 {offsets = [2, 0], sizes = [16, 16], strides = [1, 1]} : vector<18x16xf32> to vector<16x16xf32>
    %204 = vector.broadcast %39 : f32 to vector<16x16xf32>
    %205 = arith.mulf %204, %201 : vector<16x16xf32>
    %206 = arith.addf %191, %205 : vector<16x16xf32>
    %207 = vector.broadcast %40 : f32 to vector<16x16xf32>
    %208 = arith.mulf %207, %202 : vector<16x16xf32>
    %209 = arith.addf %206, %208 : vector<16x16xf32>
    %210 = vector.broadcast %41 : f32 to vector<16x16xf32>
    %211 = arith.mulf %210, %203 : vector<16x16xf32>
    %212 = arith.addf %209, %211 : vector<16x16xf32>
    %213 = vector.broadcast %66 : f32 to vector<16x16xf32>
    %214 = arith.mulf %213, %201 : vector<16x16xf32>
    %215 = arith.addf %200, %214 : vector<16x16xf32>
    %216 = vector.broadcast %67 : f32 to vector<16x16xf32>
    %217 = arith.mulf %216, %202 : vector<16x16xf32>
    %218 = arith.addf %215, %217 : vector<16x16xf32>
    %219 = vector.broadcast %68 : f32 to vector<16x16xf32>
    %220 = arith.mulf %219, %203 : vector<16x16xf32>
    %221 = arith.addf %218, %220 : vector<16x16xf32>
    %c2_45 = arith.constant 2 : index
    %c0_46 = arith.constant 0 : index
    %c0_47 = arith.constant 0 : index
    %222 = vector.load %arg10[%c2_45, %c0_46, %c0_47] : memref<3x18x18xf32, #tpu.memory_space<vmem>>, vector<1x18x18xf32>
    %223 = vector.shape_cast %222 : vector<1x18x18xf32> to vector<18x18xf32>
    %224 = vector.extract_strided_slice %223 {offsets = [0, 0], sizes = [18, 16], strides = [1, 1]} : vector<18x18xf32> to vector<18x16xf32>
    %225 = vector.extract_strided_slice %223 {offsets = [0, 1], sizes = [18, 16], strides = [1, 1]} : vector<18x18xf32> to vector<18x16xf32>
    %226 = vector.extract_strided_slice %223 {offsets = [0, 2], sizes = [18, 16], strides = [1, 1]} : vector<18x18xf32> to vector<18x16xf32>
    %227 = vector.extract_strided_slice %224 {offsets = [0, 0], sizes = [16, 16], strides = [1, 1]} : vector<18x16xf32> to vector<16x16xf32>
    %228 = vector.extract_strided_slice %225 {offsets = [0, 0], sizes = [16, 16], strides = [1, 1]} : vector<18x16xf32> to vector<16x16xf32>
    %229 = vector.extract_strided_slice %226 {offsets = [0, 0], sizes = [16, 16], strides = [1, 1]} : vector<18x16xf32> to vector<16x16xf32>
    %230 = vector.broadcast %42 : f32 to vector<16x16xf32>
    %231 = arith.mulf %230, %227 : vector<16x16xf32>
    %232 = arith.addf %212, %231 : vector<16x16xf32>
    %233 = vector.broadcast %43 : f32 to vector<16x16xf32>
    %234 = arith.mulf %233, %228 : vector<16x16xf32>
    %235 = arith.addf %232, %234 : vector<16x16xf32>
    %236 = vector.broadcast %44 : f32 to vector<16x16xf32>
    %237 = arith.mulf %236, %229 : vector<16x16xf32>
    %238 = arith.addf %235, %237 : vector<16x16xf32>
    %239 = vector.broadcast %69 : f32 to vector<16x16xf32>
    %240 = arith.mulf %239, %227 : vector<16x16xf32>
    %241 = arith.addf %221, %240 : vector<16x16xf32>
    %242 = vector.broadcast %70 : f32 to vector<16x16xf32>
    %243 = arith.mulf %242, %228 : vector<16x16xf32>
    %244 = arith.addf %241, %243 : vector<16x16xf32>
    %245 = vector.broadcast %71 : f32 to vector<16x16xf32>
    %246 = arith.mulf %245, %229 : vector<16x16xf32>
    %247 = arith.addf %244, %246 : vector<16x16xf32>
    %248 = vector.extract_strided_slice %224 {offsets = [1, 0], sizes = [16, 16], strides = [1, 1]} : vector<18x16xf32> to vector<16x16xf32>
    %249 = vector.extract_strided_slice %225 {offsets = [1, 0], sizes = [16, 16], strides = [1, 1]} : vector<18x16xf32> to vector<16x16xf32>
    %250 = vector.extract_strided_slice %226 {offsets = [1, 0], sizes = [16, 16], strides = [1, 1]} : vector<18x16xf32> to vector<16x16xf32>
    %251 = vector.broadcast %45 : f32 to vector<16x16xf32>
    %252 = arith.mulf %251, %248 : vector<16x16xf32>
    %253 = arith.addf %238, %252 : vector<16x16xf32>
    %254 = vector.broadcast %46 : f32 to vector<16x16xf32>
    %255 = arith.mulf %254, %249 : vector<16x16xf32>
    %256 = arith.addf %253, %255 : vector<16x16xf32>
    %257 = vector.broadcast %47 : f32 to vector<16x16xf32>
    %258 = arith.mulf %257, %250 : vector<16x16xf32>
    %259 = arith.addf %256, %258 : vector<16x16xf32>
    %260 = vector.broadcast %72 : f32 to vector<16x16xf32>
    %261 = arith.mulf %260, %248 : vector<16x16xf32>
    %262 = arith.addf %247, %261 : vector<16x16xf32>
    %263 = vector.broadcast %73 : f32 to vector<16x16xf32>
    %264 = arith.mulf %263, %249 : vector<16x16xf32>
    %265 = arith.addf %262, %264 : vector<16x16xf32>
    %266 = vector.broadcast %74 : f32 to vector<16x16xf32>
    %267 = arith.mulf %266, %250 : vector<16x16xf32>
    %268 = arith.addf %265, %267 : vector<16x16xf32>
    %269 = vector.extract_strided_slice %224 {offsets = [2, 0], sizes = [16, 16], strides = [1, 1]} : vector<18x16xf32> to vector<16x16xf32>
    %270 = vector.extract_strided_slice %225 {offsets = [2, 0], sizes = [16, 16], strides = [1, 1]} : vector<18x16xf32> to vector<16x16xf32>
    %271 = vector.extract_strided_slice %226 {offsets = [2, 0], sizes = [16, 16], strides = [1, 1]} : vector<18x16xf32> to vector<16x16xf32>
    %272 = vector.broadcast %48 : f32 to vector<16x16xf32>
    %273 = arith.mulf %272, %269 : vector<16x16xf32>
    %274 = arith.addf %259, %273 : vector<16x16xf32>
    %275 = vector.broadcast %49 : f32 to vector<16x16xf32>
    %276 = arith.mulf %275, %270 : vector<16x16xf32>
    %277 = arith.addf %274, %276 : vector<16x16xf32>
    %278 = vector.broadcast %50 : f32 to vector<16x16xf32>
    %279 = arith.mulf %278, %271 : vector<16x16xf32>
    %280 = arith.addf %277, %279 : vector<16x16xf32>
    %281 = vector.broadcast %75 : f32 to vector<16x16xf32>
    %282 = arith.mulf %281, %269 : vector<16x16xf32>
    %283 = arith.addf %268, %282 : vector<16x16xf32>
    %284 = vector.broadcast %76 : f32 to vector<16x16xf32>
    %285 = arith.mulf %284, %270 : vector<16x16xf32>
    %286 = arith.addf %283, %285 : vector<16x16xf32>
    %287 = vector.broadcast %77 : f32 to vector<16x16xf32>
    %288 = arith.mulf %287, %271 : vector<16x16xf32>
    %289 = arith.addf %286, %288 : vector<16x16xf32>
    %c0_48 = arith.constant 0 : index
    %c0_49 = arith.constant 0 : index
    %c0_50 = arith.constant 0 : index
    %c0_51 = arith.constant 0 : index
    %290 = vector.load %arg5[%c0_48, %c0_49, %c0_50, %c0_51] : memref<1x2x16x16xf32, #tpu.memory_space<vmem>>, vector<1x1x16x16xf32>
    %291 = vector.shape_cast %290 : vector<1x1x16x16xf32> to vector<16x16xf32>
    %292 = vector.shape_cast %280 : vector<16x16xf32> to vector<1x1x16x16xf32>
    tpu.vector_store %arg5[%c0_48, %c0_49, %c0_50, %c0_51], %292 {strides = array<i32>} : memref<1x2x16x16xf32, #tpu.memory_space<vmem>>, vector<1x1x16x16xf32>,
    %c0_52 = arith.constant 0 : index
    %c1_53 = arith.constant 1 : index
    %c0_54 = arith.constant 0 : index
    %c0_55 = arith.constant 0 : index
    %293 = vector.load %arg5[%c0_52, %c1_53, %c0_54, %c0_55] : memref<1x2x16x16xf32, #tpu.memory_space<vmem>>, vector<1x1x16x16xf32>
    %294 = vector.shape_cast %293 : vector<1x1x16x16xf32> to vector<16x16xf32>
    %295 = vector.shape_cast %289 : vector<16x16xf32> to vector<1x1x16x16xf32>
    tpu.vector_store %arg5[%c0_52, %c1_53, %c0_54, %c0_55], %295 {strides = array<i32>} : memref<1x2x16x16xf32, #tpu.memory_space<vmem>>, vector<1x1x16x16xf32>,
    %c0_56 = arith.constant 0 : index
    %c2_57 = arith.constant 2 : index
    %c2_58 = arith.constant 2 : index
    %296 = vector.load %arg11[%c0_56, %c2_57, %c2_58] : memref<2x20x20xf32, #tpu.memory_space<vmem>>, vector<1x16x16xf32>
    %297 = vector.shape_cast %296 : vector<1x16x16xf32> to vector<16x16xf32>
    %298 = vector.shape_cast %289 : vector<16x16xf32> to vector<1x16x16xf32>
    tpu.vector_store %arg11[%c0_56, %c2_57, %c2_58], %298 {strides = array<i32>} : memref<2x20x20xf32, #tpu.memory_space<vmem>>, vector<1x16x16xf32>,
    %299 = tpu.iota {dimensions = array<i32: 0>} : vector<18x18xi32>
    %300 = tpu.iota {dimensions = array<i32: 1>} : vector<18x18xi32>
    %c1_i32 = arith.constant 1 : i32
    %301 = vector.broadcast %c1_i32 : i32 to vector<18x18xi32>
    %302 = arith.cmpi sge, %299, %301 : vector<18x18xi32>
    %c16_i32 = arith.constant 16 : i32
    %303 = vector.broadcast %c16_i32 : i32 to vector<18x18xi32>
    %304 = arith.cmpi sle, %299, %303 : vector<18x18xi32>
    %305 = arith.andi %302, %304 : vector<18x18xi1>
    %c1_i32_59 = arith.constant 1 : i32
    %306 = vector.broadcast %c1_i32_59 : i32 to vector<18x18xi32>
    %307 = arith.cmpi sge, %300, %306 : vector<18x18xi32>
    %308 = arith.andi %305, %307 : vector<18x18xi1>
    %c16_i32_60 = arith.constant 16 : i32
    %309 = vector.broadcast %c16_i32_60 : i32 to vector<18x18xi32>
    %310 = arith.cmpi sle, %300, %309 : vector<18x18xi32>
    %311 = arith.andi %308, %310 : vector<18x18xi1>
    %c0_61 = arith.constant 0 : index
    %c0_62 = arith.constant 0 : index
    %c0_63 = arith.constant 0 : index
    %312 = vector.load %arg11[%c0_61, %c0_62, %c0_63] : memref<2x20x20xf32, #tpu.memory_space<vmem>>, vector<1x20x20xf32>
    %313 = vector.shape_cast %312 : vector<1x20x20xf32> to vector<20x20xf32>
    %314 = vector.extract_strided_slice %313 {offsets = [0, 0], sizes = [18, 20], strides = [1, 1]} : vector<20x20xf32> to vector<18x20xf32>
    %315 = vector.extract_strided_slice %313 {offsets = [1, 0], sizes = [18, 20], strides = [1, 1]} : vector<20x20xf32> to vector<18x20xf32>
    %cst_64 = arith.constant 2.000000e+00 : f32
    %316 = vector.broadcast %cst_64 : f32 to vector<18x20xf32>
    %317 = arith.mulf %316, %315 : vector<18x20xf32>
    %318 = arith.addf %314, %317 : vector<18x20xf32>
    %319 = vector.extract_strided_slice %313 {offsets = [2, 0], sizes = [18, 20], strides = [1, 1]} : vector<20x20xf32> to vector<18x20xf32>
    %320 = arith.addf %318, %319 : vector<18x20xf32>
    %cst_65 = arith.constant 2.500000e-01 : f32
    %321 = vector.broadcast %cst_65 : f32 to vector<18x20xf32>
    %322 = arith.mulf %321, %320 : vector<18x20xf32>
    %323 = vector.extract_strided_slice %322 {offsets = [0, 0], sizes = [18, 18], strides = [1, 1]} : vector<18x20xf32> to vector<18x18xf32>
    %324 = vector.extract_strided_slice %322 {offsets = [0, 1], sizes = [18, 18], strides = [1, 1]} : vector<18x20xf32> to vector<18x18xf32>
    %cst_66 = arith.constant 2.000000e+00 : f32
    %325 = vector.broadcast %cst_66 : f32 to vector<18x18xf32>
    %326 = arith.mulf %325, %324 : vector<18x18xf32>
    %327 = arith.addf %323, %326 : vector<18x18xf32>
    %328 = vector.extract_strided_slice %322 {offsets = [0, 2], sizes = [18, 18], strides = [1, 1]} : vector<18x20xf32> to vector<18x18xf32>
    %329 = arith.addf %327, %328 : vector<18x18xf32>
    %cst_67 = arith.constant 2.500000e-01 : f32
    %330 = vector.broadcast %cst_67 : f32 to vector<18x18xf32>
    %331 = arith.mulf %330, %329 : vector<18x18xf32>
    %cst_68 = arith.constant 0.000000e+00 : f32
    %332 = vector.broadcast %cst_68 : f32 to vector<18x18xf32>
    %333 = arith.select %311, %331, %332 : vector<18x18xi1>, vector<18x18xf32>
    %334 = vector.extract_strided_slice %333 {offsets = [0, 0], sizes = [16, 18], strides = [1, 1]} : vector<18x18xf32> to vector<16x18xf32>
    %335 = vector.extract_strided_slice %333 {offsets = [1, 0], sizes = [16, 18], strides = [1, 1]} : vector<18x18xf32> to vector<16x18xf32>
    %cst_69 = arith.constant 2.000000e+00 : f32
    %336 = vector.broadcast %cst_69 : f32 to vector<16x18xf32>
    %337 = arith.mulf %336, %335 : vector<16x18xf32>
    %338 = arith.addf %334, %337 : vector<16x18xf32>
    %339 = vector.extract_strided_slice %333 {offsets = [2, 0], sizes = [16, 18], strides = [1, 1]} : vector<18x18xf32> to vector<16x18xf32>
    %340 = arith.addf %338, %339 : vector<16x18xf32>
    %341 = vector.extract_strided_slice %333 {offsets = [2, 0], sizes = [16, 18], strides = [1, 1]} : vector<18x18xf32> to vector<16x18xf32>
    %342 = vector.extract_strided_slice %333 {offsets = [0, 0], sizes = [16, 18], strides = [1, 1]} : vector<18x18xf32> to vector<16x18xf32>
    %343 = arith.subf %341, %342 : vector<16x18xf32>
    %344 = vector.extract_strided_slice %340 {offsets = [0, 2], sizes = [16, 16], strides = [1, 1]} : vector<16x18xf32> to vector<16x16xf32>
    %345 = vector.extract_strided_slice %340 {offsets = [0, 0], sizes = [16, 16], strides = [1, 1]} : vector<16x18xf32> to vector<16x16xf32>
    %346 = arith.subf %344, %345 : vector<16x16xf32>
    %347 = vector.extract_strided_slice %343 {offsets = [0, 0], sizes = [16, 16], strides = [1, 1]} : vector<16x18xf32> to vector<16x16xf32>
    %348 = vector.extract_strided_slice %343 {offsets = [0, 1], sizes = [16, 16], strides = [1, 1]} : vector<16x18xf32> to vector<16x16xf32>
    %cst_70 = arith.constant 2.000000e+00 : f32
    %349 = vector.broadcast %cst_70 : f32 to vector<16x16xf32>
    %350 = arith.mulf %349, %348 : vector<16x16xf32>
    %351 = arith.addf %347, %350 : vector<16x16xf32>
    %352 = vector.extract_strided_slice %343 {offsets = [0, 2], sizes = [16, 16], strides = [1, 1]} : vector<16x18xf32> to vector<16x16xf32>
    %353 = arith.addf %351, %352 : vector<16x16xf32>
    %c0_71 = arith.constant 0 : index
    %c0_72 = arith.constant 0 : index
    %c0_73 = arith.constant 0 : index
    %c0_74 = arith.constant 0 : index
    %354 = vector.load %arg6[%c0_71, %c0_72, %c0_73, %c0_74] : memref<1x1x16x16xf32, #tpu.memory_space<vmem>>, vector<1x1x16x16xf32>
    %355 = vector.shape_cast %354 : vector<1x1x16x16xf32> to vector<16x16xf32>
    %356 = vector.shape_cast %346 : vector<16x16xf32> to vector<1x1x16x16xf32>
    tpu.vector_store %arg6[%c0_71, %c0_72, %c0_73, %c0_74], %356 {strides = array<i32>} : memref<1x1x16x16xf32, #tpu.memory_space<vmem>>, vector<1x1x16x16xf32>,
    %c0_75 = arith.constant 0 : index
    %c0_76 = arith.constant 0 : index
    %c0_77 = arith.constant 0 : index
    %c0_78 = arith.constant 0 : index
    %357 = vector.load %arg7[%c0_75, %c0_76, %c0_77, %c0_78] : memref<1x1x16x16xf32, #tpu.memory_space<vmem>>, vector<1x1x16x16xf32>
    %358 = vector.shape_cast %357 : vector<1x1x16x16xf32> to vector<16x16xf32>
    %359 = vector.shape_cast %353 : vector<16x16xf32> to vector<1x1x16x16xf32>
    tpu.vector_store %arg7[%c0_75, %c0_76, %c0_77, %c0_78], %359 {strides = array<i32>} : memref<1x1x16x16xf32, #tpu.memory_space<vmem>>, vector<1x1x16x16xf32>,
    %c1_79 = arith.constant 1 : index
    %c0_80 = arith.constant 0 : index
    %c0_81 = arith.constant 0 : index
    %360 = vector.load %arg11[%c1_79, %c0_80, %c0_81] : memref<2x20x20xf32, #tpu.memory_space<vmem>>, vector<1x20x20xf32>
    %361 = vector.shape_cast %360 : vector<1x20x20xf32> to vector<20x20xf32>
    %362 = vector.extract_strided_slice %361 {offsets = [0, 0], sizes = [18, 20], strides = [1, 1]} : vector<20x20xf32> to vector<18x20xf32>
    %363 = vector.extract_strided_slice %361 {offsets = [1, 0], sizes = [18, 20], strides = [1, 1]} : vector<20x20xf32> to vector<18x20xf32>
    %cst_82 = arith.constant 2.000000e+00 : f32
    %364 = vector.broadcast %cst_82 : f32 to vector<18x20xf32>
    %365 = arith.mulf %364, %363 : vector<18x20xf32>
    %366 = arith.addf %362, %365 : vector<18x20xf32>
    %367 = vector.extract_strided_slice %361 {offsets = [2, 0], sizes = [18, 20], strides = [1, 1]} : vector<20x20xf32> to vector<18x20xf32>
    %368 = arith.addf %366, %367 : vector<18x20xf32>
    %cst_83 = arith.constant 2.500000e-01 : f32
    %369 = vector.broadcast %cst_83 : f32 to vector<18x20xf32>
    %370 = arith.mulf %369, %368 : vector<18x20xf32>
    %371 = vector.extract_strided_slice %370 {offsets = [0, 0], sizes = [18, 18], strides = [1, 1]} : vector<18x20xf32> to vector<18x18xf32>
    %372 = vector.extract_strided_slice %370 {offsets = [0, 1], sizes = [18, 18], strides = [1, 1]} : vector<18x20xf32> to vector<18x18xf32>
    %cst_84 = arith.constant 2.000000e+00 : f32
    %373 = vector.broadcast %cst_84 : f32 to vector<18x18xf32>
    %374 = arith.mulf %373, %372 : vector<18x18xf32>
    %375 = arith.addf %371, %374 : vector<18x18xf32>
    %376 = vector.extract_strided_slice %370 {offsets = [0, 2], sizes = [18, 18], strides = [1, 1]} : vector<18x20xf32> to vector<18x18xf32>
    %377 = arith.addf %375, %376 : vector<18x18xf32>
    %cst_85 = arith.constant 2.500000e-01 : f32
    %378 = vector.broadcast %cst_85 : f32 to vector<18x18xf32>
    %379 = arith.mulf %378, %377 : vector<18x18xf32>
    %cst_86 = arith.constant 0.000000e+00 : f32
    %380 = vector.broadcast %cst_86 : f32 to vector<18x18xf32>
    %381 = arith.select %311, %379, %380 : vector<18x18xi1>, vector<18x18xf32>
    %382 = vector.extract_strided_slice %381 {offsets = [0, 0], sizes = [16, 18], strides = [1, 1]} : vector<18x18xf32> to vector<16x18xf32>
    %383 = vector.extract_strided_slice %381 {offsets = [1, 0], sizes = [16, 18], strides = [1, 1]} : vector<18x18xf32> to vector<16x18xf32>
    %cst_87 = arith.constant 2.000000e+00 : f32
    %384 = vector.broadcast %cst_87 : f32 to vector<16x18xf32>
    %385 = arith.mulf %384, %383 : vector<16x18xf32>
    %386 = arith.addf %382, %385 : vector<16x18xf32>
    %387 = vector.extract_strided_slice %381 {offsets = [2, 0], sizes = [16, 18], strides = [1, 1]} : vector<18x18xf32> to vector<16x18xf32>
    %388 = arith.addf %386, %387 : vector<16x18xf32>
    %389 = vector.extract_strided_slice %381 {offsets = [2, 0], sizes = [16, 18], strides = [1, 1]} : vector<18x18xf32> to vector<16x18xf32>
    %390 = vector.extract_strided_slice %381 {offsets = [0, 0], sizes = [16, 18], strides = [1, 1]} : vector<18x18xf32> to vector<16x18xf32>
    %391 = arith.subf %389, %390 : vector<16x18xf32>
    %392 = vector.extract_strided_slice %388 {offsets = [0, 2], sizes = [16, 16], strides = [1, 1]} : vector<16x18xf32> to vector<16x16xf32>
    %393 = vector.extract_strided_slice %388 {offsets = [0, 0], sizes = [16, 16], strides = [1, 1]} : vector<16x18xf32> to vector<16x16xf32>
    %394 = arith.subf %392, %393 : vector<16x16xf32>
    %395 = vector.extract_strided_slice %391 {offsets = [0, 0], sizes = [16, 16], strides = [1, 1]} : vector<16x18xf32> to vector<16x16xf32>
    %396 = vector.extract_strided_slice %391 {offsets = [0, 1], sizes = [16, 16], strides = [1, 1]} : vector<16x18xf32> to vector<16x16xf32>
    %cst_88 = arith.constant 2.000000e+00 : f32
    %397 = vector.broadcast %cst_88 : f32 to vector<16x16xf32>
    %398 = arith.mulf %397, %396 : vector<16x16xf32>
    %399 = arith.addf %395, %398 : vector<16x16xf32>
    %400 = vector.extract_strided_slice %391 {offsets = [0, 2], sizes = [16, 16], strides = [1, 1]} : vector<16x18xf32> to vector<16x16xf32>
    %401 = arith.addf %399, %400 : vector<16x16xf32>
    %c0_89 = arith.constant 0 : index
    %c0_90 = arith.constant 0 : index
    %c0_91 = arith.constant 0 : index
    %c0_92 = arith.constant 0 : index
    %402 = vector.load %arg8[%c0_89, %c0_90, %c0_91, %c0_92] : memref<1x1x16x16xf32, #tpu.memory_space<vmem>>, vector<1x1x16x16xf32>
    %403 = vector.shape_cast %402 : vector<1x1x16x16xf32> to vector<16x16xf32>
    %404 = vector.shape_cast %394 : vector<16x16xf32> to vector<1x1x16x16xf32>
    tpu.vector_store %arg8[%c0_89, %c0_90, %c0_91, %c0_92], %404 {strides = array<i32>} : memref<1x1x16x16xf32, #tpu.memory_space<vmem>>, vector<1x1x16x16xf32>,
    %c0_93 = arith.constant 0 : index
    %c0_94 = arith.constant 0 : index
    %c0_95 = arith.constant 0 : index
    %c0_96 = arith.constant 0 : index
    %405 = vector.load %arg9[%c0_93, %c0_94, %c0_95, %c0_96] : memref<1x1x16x16xf32, #tpu.memory_space<vmem>>, vector<1x1x16x16xf32>
    %406 = vector.shape_cast %405 : vector<1x1x16x16xf32> to vector<16x16xf32>
    %407 = vector.shape_cast %401 : vector<16x16xf32> to vector<1x1x16x16xf32>
    tpu.vector_store %arg9[%c0_93, %c0_94, %c0_95, %c0_96], %407 {strides = array<i32>} : memref<1x1x16x16xf32, #tpu.memory_space<vmem>>, vector<1x1x16x16xf32>,
    return
  }
  func.func @transform_0(%arg0: i32) -> (i32, i32, i32, i32) {
    %c0_i32 = arith.constant 0 : i32
    %c0_i32_0 = arith.constant 0 : i32
    %c0_i32_1 = arith.constant 0 : i32
    %c0_i32_2 = arith.constant 0 : i32
    return %arg0, %c0_i32, %c0_i32_0, %c0_i32_1 : i32, i32, i32, i32
  }
  func.func @transform_1(%arg0: i32) -> (i32, i32, i32, i32) {
    %c0_i32 = arith.constant 0 : i32
    %c0_i32_0 = arith.constant 0 : i32
    %c0_i32_1 = arith.constant 0 : i32
    %c0_i32_2 = arith.constant 0 : i32
    return %arg0, %c0_i32, %c0_i32_0, %c0_i32_1 : i32, i32, i32, i32
  }
  func.func @transform_2(%arg0: i32) -> i32 {
    %c0_i32 = arith.constant 0 : i32
    %c0_i32_0 = arith.constant 0 : i32
    return %c0_i32 : i32
  }
  func.func @transform_3(%arg0: i32) -> i32 {
    %c0_i32 = arith.constant 0 : i32
    %c0_i32_0 = arith.constant 0 : i32
    return %c0_i32 : i32
  }
  func.func @transform_4(%arg0: i32) -> (i32, i32, i32, i32) {
    %c0_i32 = arith.constant 0 : i32
    %c0_i32_0 = arith.constant 0 : i32
    %c0_i32_1 = arith.constant 0 : i32
    %c0_i32_2 = arith.constant 0 : i32
    return %arg0, %c0_i32, %c0_i32_0, %c0_i32_1 : i32, i32, i32, i32
  }
  func.func @transform_5(%arg0: i32) -> (i32, i32, i32, i32) {
    %c0_i32 = arith.constant 0 : i32
    %c0_i32_0 = arith.constant 0 : i32
    %c0_i32_1 = arith.constant 0 : i32
    %c0_i32_2 = arith.constant 0 : i32
    return %arg0, %c0_i32, %c0_i32_0, %c0_i32_1 : i32, i32, i32, i32
  }
  func.func @transform_6(%arg0: i32) -> (i32, i32, i32, i32) {
    %c0_i32 = arith.constant 0 : i32
    %c0_i32_0 = arith.constant 0 : i32
    %c0_i32_1 = arith.constant 0 : i32
    %c0_i32_2 = arith.constant 0 : i32
    return %arg0, %c0_i32, %c0_i32_0, %c0_i32_1 : i32, i32, i32, i32
  }
  func.func @transform_7(%arg0: i32) -> (i32, i32, i32, i32) {
    %c0_i32 = arith.constant 0 : i32
    %c0_i32_0 = arith.constant 0 : i32
    %c0_i32_1 = arith.constant 0 : i32
    %c0_i32_2 = arith.constant 0 : i32
    return %arg0, %c0_i32, %c0_i32_0, %c0_i32_1 : i32, i32, i32, i32
  }
  func.func @transform_8(%arg0: i32) -> (i32, i32, i32, i32) {
    %c0_i32 = arith.constant 0 : i32
    %c0_i32_0 = arith.constant 0 : i32
    %c0_i32_1 = arith.constant 0 : i32
    %c0_i32_2 = arith.constant 0 : i32
    return %arg0, %c0_i32, %c0_i32_0, %c0_i32_1 : i32, i32, i32, i32
  }
}

</mosaic_0001>

<bundles_post_ra>
// kernel: rail_model_forward.1
= control target key start
LH: loop header
LB: loop body
LE: loop exit
PB: predicated region body
PF: predicated region fallthrough
CT: control target
= control target key end

     0   :  { %s3655_s0 = inlined_call_operand.hbm [shape: f32[2,3,16,16], index: 0, kind: input, shape index: {}]   ;;  %s3656_s1 = inlined_call_operand.vmem [shape: f32[2,1,16,16], index: 1, kind: input, shape index: {}]   ;;  %s3657_s2 = inlined_call_operand.vmem [shape: f32[54], index: 2, kind: input, shape index: {}]   ;;  %s3658_s3 = inlined_call_operand.vmem [shape: f32[2], index: 3, kind: input, shape index: {}]   ;;  %s3659_s4 = inlined_call_operand.hbm [shape: f32[2,2,16,16], index: 4, kind: output, shape index: {0}]   ;;  %s3660_s5 = inlined_call_operand.hbm [shape: f32[2,1,16,16], index: 5, kind: output, shape index: {1}]   ;;  %s3661_s6 = inlined_call_operand.hbm [shape: f32[2,1,16,16], index: 6, kind: output, shape index: {2}]   ;;  %s3662_s7 = inlined_call_operand.hbm [shape: f32[2,1,16,16], index: 7, kind: output, shape index: {3}]   ;;  %s3663_s8 = inlined_call_operand.hbm [shape: f32[2,1,16,16], index: 8, kind: output, shape index: {4}]  }
   0x1   :  { %3675 = sst [smem:[#allocation24_spill]] %s3655_s0 }
   0x2   :  { %3676 = sst [smem:[#allocation25_spill]] %s3656_s1 }
   0x3   :  { %3677 = sst [smem:[#allocation26_spill]] %s3657_s2 }
   0x4   :  { %3678 = sst [smem:[#allocation27_spill]] %s3658_s3 }
   0x5   :  { %3679 = sst [smem:[#allocation28_spill]] %s3659_s4 }
   0x6   :  { %14 = vsyncpa [#allocation5], 0 }
   0x7   :  { %16 = vsyncpa [#allocation5 + $0x1], 0 }
   0x8   :  { %17 = vsyncpa [#allocation7], 0 }
   0x9   :  { %18 = vsyncpa [#allocation10], 0 }
   0xa   :  { %19 = vsyncpa [#allocation6], 0 }
   0xb   :  { %21 = vsyncpa [#allocation6 + $0x1], 0 }
   0xc   :  { %22 = vsyncpa [#allocation13], 0 }
   0xd   :  { %24 = vsyncpa [#allocation13 + $0x1], 0 }
   0xe   :  { %25 = vsyncpa [#allocation16], 0 }
   0xf   :  { %27 = vsyncpa [#allocation16 + $0x1], 0  ;;  %s2639_s27 = smov 0   ;;  %s2641_s28 = smov 0  }
  0x10   :  { %s2643_s29 = smov 0   ;;  %s2645_s30 = smov 0  }
  0x11 LB: > { %s2660_s9 = sadd.s32 4294967295, %s2575_s30   ;;  %s3669_s10 = sadd.s32 4294967294, %s2575_s30   ;;  %s2575_s30 = sphi %s2645_s30, %s3716_s30   ;;  %s2571_s29 = sphi %s2643_s29, %s3715_s29   ;;  %s2567_s28 = sphi %s2641_s28, %s3714_s28   ;;  %s2563_s27 = sphi %s2639_s27, %s3713_s27  }
  0x12   : > { %s2664_s11 = sadd.s32 1, %s2575_s30   ;;  %s40_s12 = sadd.s32 1, %s2571_s29 }
  0x13   : > { %s37_s13 = ssub.s32 %s2575_s30, %s2664_s11  ;;  %p47_p0 = scmp.ne.s32.totalorder %s2571_s29, %s2567_s28 }
  0x14   : > { %p38_p1 = scmp.eq.s32.totalorder %s37_s13, 0  ;;  %p48_p2 = scmp.eq.s32.totalorder %s2575_s30, 0 }
  0x15   : > { %p53_p3 = scmp.ne.s32.totalorder %s2567_s28, %s2563_s27  ;;  %p3664_p4 = scmp.eq.s32.totalorder %s2660_s9, 0 }
  0x16   : > { %s2676_s14 = scalar_select %p38_p1, %s2571_s29, %s40_s12  }
  0x17   : > { %p2678_p5 = por %p48_p2, %p47_p0  ;;  %p2684_p6 = por %p3664_p4, %p53_p3 }
  0x18   : > { %p145_p7 = scmp.eq.s32.totalorder %s2660_s9, 1  ;;  %p151_p8 = scmp.eq.s32.totalorder %s3669_s10, 1 }
  0x19   : > { %s3681_s16 = scalar_select %p2684_p6, 1, 0 }
  0x1a   : > { %p2115_p9 = scmp.ge.s32.totalorder %s2575_s30, 1  ;;  %p262_p10 = scmp.lt.s32.totalorder %s2575_s30, 3 }
  0x1b   : > { %p2693_p11 = por %p145_p7, %p47_p0  ;;  %p2697_p12 = por %p151_p8, %p53_p3 }
  0x1c   : > { %p2701_p13 = pnand %p2115_p9, %p262_p10  ;;  %s3685_s2 = sld [smem:[#allocation26_spill]] }
  0x1d   : > { %s3682_s17 = scalar_select %p2693_p11, 1, 0 }
  0x1e   : > { %s3683_s18 = scalar_select %p2697_p12, 1, 0 }
  0x1f   : > { %s3684_s19 = scalar_select %p2701_p13, 1, 0 }
  0x20   : > { %p2236_p1 = pneg %p2701_p13  ;;  %p2265_p2 = scmp.lt.s32.totalorder %s2575_s30, 2 }
  0x21   : > { %s3687_s3 = sld [smem:[#allocation27_spill]] }
  0x22   : > { %s275_s22 = sshll.u32 %s3685_s2, 4  ;;  %p2714_p7 = pnand %p2236_p1, %p3664_p4  ;;  %s276_s22 = int_to_ptr.vmem [resolvable:$true] %s275_s22 }
  0x23   : > { %p2723_p3 = pnand %p2265_p2, %p2678_p5  ;;  %s2321_s13 = scalar_lea.vmem %s276_s22, 16 }
  0x24   : > { %p2322_p8 = scmp.ne.s32.totalorder %s276_s22, %s2321_s13  ;;  %p2323_p9 = pneg %p2714_p7 }
  0x25   : > { %s3688_s12 = scalar_select %p2723_p3, 1, 0 }
  0x26   : > { %p2324_p10 = pnand %p2323_p9, %p2322_p8  ;;  %p2329_p0 = scmp.lt.s32.totalorder %s276_s22, %s276_s22 }
  0x27   : > { %s286_s26 = sshll.u32 %s3687_s3, 4  ;;  %p2330_p4 = scmp.lt.s32.totalorder %s2321_s13, %s2321_s13  ;;  %s287_s26 = int_to_ptr.vmem [resolvable:$true] %s286_s26 }
  0x28   : > { %p2325_p1 = pneg %p2324_p10 }
  0x29   : > { %p2331_p12 = por %p2330_p4, %p2329_p0 }
  0x2b   : > { %p2332_p11 = pnand %p2331_p12, %p2325_p1 }
  0x2d   : > { %2335 = shalt.err (!%p2332_p11)
}
  0x2e   : > { %s2577_s20 = smov [#allocation8]   ;;  %s297_s15 = sand.u32 1, %s2571_s29  }
  0x2f   : > { %2239 = dma.vmem_to_smem (!%p2714_p7), %s276_s22, 16, %s2577_s20, [#allocation7]  }
  0x30   : > { %s2336_s21 = scalar_lea.vmem %s287_s26, 16  ;;  %p2344_p8 = scmp.lt.s32.totalorder %s287_s26, %s287_s26 }
  0x31   : > { %p2337_p5 = scmp.ne.s32.totalorder %s287_s26, %s2336_s21  ;;  %p2345_p10 = scmp.lt.s32.totalorder %s2336_s21, %s2336_s21 }
  0x33   : > { %p2339_p2 = pnand %p2337_p5, %p2323_p9  ;;  %p2346_p13 = por %p2345_p10, %p2344_p8 }
  0x35   : > { %p2340_p6 = pneg %p2339_p2 }
  0x37   : > { %p2347_p3 = pnand %p2346_p13, %p2340_p6 }
  0x39   : > { %2350 = shalt.err (!%p2347_p3)
}
  0x3a   : > { %s2578_s24 = smov [#allocation9]   ;;  %s2213_s22 = smul.u32 48, %s297_s15 }
  0x3b   : > { %2242 = dma.vmem_to_smem (!%p2714_p7), %s287_s26, 16, %s2578_s24, [#allocation10]  }
  0x3c   : > { %s2214_s25 = smul.u32 768, %s2575_s30  ;;  %s3689_s0 = sld [smem:[#allocation24_spill]] }
  0x3d   : > { %s301_s21 = scalar_lea.vmem [#allocation4], %s2213_s22  ;;  %s2748_s23 = scalar_lea.sflag [#allocation5], %s297_s15 }
  0x3e   : > { %s308_s2 = sshll.u32 %s301_s21, 4  ;;  %p3690_p6 = scmp.ne.s32.totalorder %s3688_s12, 0  ;;  %s2746_s2 = int_to_ptr.vmem [resolvable:$true] %s308_s2 }
  0x40   : > { %p2353_p11 = pneg %p3690_p6 }
  0x42   : > { %s2744_s10 = scalar_lea.hbm %s3689_s0, %s2214_s25  ;;  %s2356_s25 = scalar_lea.hbm %s3689_s0, 1536 }
  0x43   : > { %s2351_s3 = scalar_lea.hbm %s2744_s10, 768  ;;  %p2357_p0 = scmp.lt.u32.totalorder %s2744_s10, %s3689_s0 }
  0x44   : > { %p2352_p4 = scmp.ne.s32.totalorder %s2744_s10, %s2351_s3  ;;  %p2358_p7 = scmp.lt.u32.totalorder %s2356_s25, %s2351_s3 }
  0x45   : > { %p2360_p9 = scmp.lt.u32.totalorder %s2351_s3, %s2744_s10 }
  0x46   : > { %p2354_p12 = pnand %p2353_p11, %p2352_p4  ;;  %p2359_p3 = por %p2358_p7, %p2357_p0 }
  0x48   : > { %p2355_p13 = pneg %p2354_p12  ;;  %p2361_p1 = por %p2360_p9, %p2359_p3 }
  0x4a   : > { %p2362_p5 = pnand %p2361_p1, %p2355_p13 }
  0x4c   : > { %2365 = shalt.err (!%p2362_p5)
}
  0x4d   : > { %s2366_s15 = scalar_lea.vmem %s2746_s2, 768  ;;  %s2579_s22 = smov [#allocation4]  }
  0x4e   : > { %p2367_p2 = scmp.ne.s32.totalorder %s2746_s2, %s2366_s15  ;;  %s2371_s21 = sshll.u32 %s2579_s22, 4  ;;  %s2372_s21 = int_to_ptr.vmem [resolvable:$false] %s2371_s21 }
  0x4f   : > { %s2373_s26 = scalar_lea.vmem %s2372_s21, 1536  ;;  %p2374_p4 = scmp.lt.s32.totalorder %s2746_s2, %s2372_s21 }
  0x50   : > { %p2369_p8 = pnand %p2367_p2, %p2353_p11  ;;  %p2375_p12 = scmp.lt.s32.totalorder %s2373_s26, %s2366_s15 }
  0x52   : > { %p2370_p10 = pneg %p2369_p8  ;;  %p2376_p0 = por %p2375_p12, %p2374_p4 }
  0x54   : > { %p2377_p7 = pnand %p2376_p0, %p2370_p10 }
  0x56   : > { %2380 = shalt.err (!%p2377_p7)
}
  0x57   : > { %s2580_s3 = smov 128   ;;  %s2581_s24 = smov 8  }
  0x58   : > { %2246 = dma.hbm_to_vmem [thread:$0]  (!%p3690_p6), %s2744_s10, 768, %s2746_s2, %s2748_s23, %s2580_s3, %s2580_s3, %s2581_s24  }
  0x59   : > { %p3691_p11 = scmp.ne.s32.totalorder %s3684_s19, 0 }
  0x5a   : > { %s2779_s25 = sand.u32 (!%p3691_p11), 1, %s2567_s28   ;;  %p3692_p13 = scmp.ne.s32.totalorder (!%p3691_p11), %s3681_s16, 0 }
  0x5b   : > { %328 = sbr.rel (%p3691_p11) target bundleno = 1065 (0x429), region = 36  ;;  %s331_s20 = scalar_lea.sflag (!%p3691_p11), [#allocation5], %s2779_s25 }
  0x5c   : > { %s2215_s13 = smul.u32 (!%p3691_p11), 48, %s2779_s25 }
  0x5e   : > { %s334_s15 = scalar_lea.vmem (!%p3691_p11), [#allocation4], %s2215_s13 }
  0x62   : > { %2538 = dma.done.wait (%p3692_p13), %s331_s20, 768  }
  0x63   : > { %2540 = vsyncadd (%p3692_p13), %s331_s20, 4294966528  ;;  %p3693_p3 = scmp.eq.s32.totalorder %s2660_s9, 0 }
  0x65   : > { %2542 = dma.done.wait (%p3693_p3), [#allocation7], 16   ;;  %p3694_p6 = pmov %p3693_p3 }
  0x66   : > { %p3695_p9 = pmov %p3693_p3 }
  0x67   : > { %2544 = vsyncadd (%p3694_p6), [#allocation7], 4294967280 }
  0x68   : > { %2546 = dma.done.wait (%p3695_p9), [#allocation10], 16   ;;  %p3696_p1 = pmov %p3693_p3 }
  0x6a   : > { %2548 = vsyncadd (%p3696_p1), [#allocation10], 4294967280 }
  0x6b   : > { %347 = sfence }
  0x6c   : > { %v425_v0 = vld [vmem:[%s334_s15] sm:$0xff]  ;;  %v2130_v1 = vld [vmem:[%s334_s15 + $0x10] sm:$0xff]  ;;  %vm406_vm0 = vcmask 146432   ;;  %s2582_s2 = smov 1   ;;  %vm409_vm1 = vcmask 140288   ;;  %v426_v2 = vld [vmem:[%s334_s15 + $0x8] sm:$0xff] }
  0x6d   : > { %429 = vrot.lane.b32.xlu0 %v425_v0, %s2582_s2  ;;  %443 = vrot.lane.b32.xlu1 %v2130_v1, %s2582_s2  ;;  %v2131_v3 = vld [vmem:[%s334_s15 + $0x18] sm:$0xff]  ;;  %v2583_v4 = vmov 0.0   ;;  %v2132_v5 = vld [vmem:[%s334_s15 + $0x20] sm:$0xff]  ;;  %vm435_vm2 = vcmask 138248   ;;  %s2161_s10 = sld [smem:[#allocation8 + $0x1c]]  ;;  %s2162_s16 = sld [smem:[#allocation8 + $0x1d]] }
  0x6e   : > { %407 = vst.msk [vmem:[#allocation2] sm:$0xff] %vm406_vm0, %v2583_v4  ;;  %408 = vst.msk [vmem:[#allocation2 + $0x8] sm:$0xff] %vm406_vm0, %v2583_v4  ;;  %v2133_v6 = vld [vmem:[%s334_s15 + $0x28] sm:$0xff]  ;;  %s2806_s19 = sld [smem:[#allocation8 + $0x25]]  ;;  %s2815_s12 = sld [smem:[#allocation8 + $0x26]]  ;;  %vm612_vm3 = vcmask 1046528  }
  0x6f   : > { %411 = vst.msk [vmem:[#allocation2 + $0x18] sm:$0xff] %vm406_vm0, %v2583_v4  ;;  %412 = vst.msk [vmem:[#allocation2 + $0x20] sm:$0xff] %vm406_vm0, %v2583_v4  ;;  %s2584_s23 = smov 127   ;;  %s2823_s22 = sld [smem:[#allocation8 + $0x2e]]  ;;  %vm725_vm4 = vcmask 1045504   ;;  %vm417_vm5 = vcmask 162816  }
  0x70   : > { %414 = vst.msk [vmem:[#allocation2 + $0x30] sm:$0xff] %vm406_vm0, %v2583_v4  ;;  %415 = vst.msk [vmem:[#allocation2 + $0x38] sm:$0xff] %vm406_vm0, %v2583_v4  ;;  %s2164_s21 = sld [smem:[#allocation8 + $0x1f]]  ;;  %s2585_s26 = smov 126   ;;  %vm420_vm6 = vcmask 158720   ;;  %vm1409_vm7 = vcmask 130048  }
  0x71   : > { %410 = vst.msk [vmem:[#allocation2 + $0x10] sm:$0x3] %vm409_vm1, %v2583_v4  ;;  %413 = vst.msk [vmem:[#allocation2 + $0x28] sm:$0x3] %vm409_vm1, %v2583_v4  ;;  %431 = vrot.lane.b32.xlu0 %v426_v2, %s2582_s2  ;;  %445 = vrot.lane.b32.xlu1 %v2131_v3, %s2582_s2  ;;  %s2165_s3 = sld [smem:[#allocation8 + $0x20]]  ;;  %s2167_s24 = sld [smem:[#allocation8 + $0x22]] }
  0x72   : > { %416 = vst.msk [vmem:[#allocation2 + $0x40] sm:$0x3] %vm409_vm1, %v2583_v4  ;;  %s2168_s13 = sld [smem:[#allocation8 + $0x23]]  ;;  %s2173_s20 = sld [smem:[#allocation8 + $0x28]]  ;;  %vm477_vm8 = vcmask 146448  }
  0x73   : > { %v579_v11 = vstv %s2161_s10  ;;  %v592_v16 = vstv %s2162_s16  ;;  %s2174_s15 = sld [smem:[#allocation8 + $0x29]]  ;;  %s2177_s10 = sld [smem:[#allocation8 + $0x2c]]  ;;  %423 = vst.msk [vmem:[#allocation3 + $0x20] sm:$0xff] %vm417_vm5, %v2583_v4  ;;  %418 = vst.msk [vmem:[#allocation3] sm:$0xff] %vm417_vm5, %v2583_v4 }
  0x74   : > { %v870_v19 = vstv %s2806_s19  ;;  %v883_v25 = vstv %s2815_s12  ;;  %s2182_s16 = sld [smem:[#allocation8 + $0x31]]  ;;  %s2894_s19 = sld [smem:[#allocation8 + $0x2f]]  ;;  %424 = vst.msk [vmem:[#allocation3 + $0x28] sm:$0xf] %vm420_vm6, %v2583_v4  ;;  %421 = vst.msk [vmem:[#allocation3 + $0x10] sm:$0xf] %vm420_vm6, %v2583_v4 }
  0x75   : > { %457 = vrot.lane.b32.xlu0 %v2132_v5, %s2582_s2  ;;  %459 = vrot.lane.b32.xlu1 %v2133_v6, %s2582_s2  ;;  %v1159_v27 = vstv %s2823_s22  ;;  %s2176_s2 = sld [smem:[#allocation8 + $0x2b]]  ;;  %s2183_s12 = sld [smem:[#allocation8 + $0x32]]  ;;  %419 = vst.msk [vmem:[#allocation3 + $0x8] sm:$0xff] %vm417_vm5, %v2583_v4  ;;  %422 = vst.msk [vmem:[#allocation3 + $0x18] sm:$0xff] %vm417_vm5, %v2583_v4 }
  0x76   : > { %v678_v30 = vstv %s2164_s21  ;;  %s2185_s22 = sld [smem:[#allocation8 + $0x34]]  ;;  %s2186_s21 = sld [smem:[#allocation8 + $0x35]] }
  0x77   : > { %v698_v37 = vstv %s2165_s3  ;;  %v791_v45 = vstv %s2167_s24  ;;  %p401_p5 = scmp.lt.s32.totalorder %s2660_s9, 1  ;;  %s3697_s1 = sld [smem:[#allocation25_spill]] }
  0x78   : > { %v811_v52 = vstv %s2168_s13  ;;  %v968_v55 = vstv %s2173_s20  ;;  %s2998_s13 = sld [smem:[#allocation8 + $0x2d]]  ;;  %s2184_s20 = sld [smem:[#allocation8 + $0x33]] }
  0x79   : > { %v988_v1 = vstv %s2174_s15  ;;  %s402_s3 = scalar_select %p401_p5, %s2660_s9, 1 }
  0x7a   : > { %s3704_s4 = sld [smem:[#allocation28_spill]]  ;;  %p3705_p8 = scmp.ne.s32.totalorder %s3682_s17, 0 }
  0x7b   : > { %s2207_s24 = sshll.u32 %s402_s3, 4  ;;  %s2175_s3 = sld [smem:[#allocation8 + $0x2a]] }
  0x7d   : > { %s405_s15 = scalar_lea.vmem %s3697_s1, %s2207_s24  ;;  %s2181_s24 = sld [smem:[#allocation8 + $0x30]] }
  0xdf   : > { %v430_v7 = vpop.permute.xlu0 %429  ;;  %v444_v8 = vpop.permute.xlu1 %443 }
  0xe0   : > { %436 = vst.msk [vmem:[#allocation2 + $0x1] sm:$0xff] %vm435_vm2, %v430_v7  ;;  %450 = vst.msk [vmem:[#allocation2 + $0x19] sm:$0xff] %vm435_vm2, %v444_v8 }
  0xe3   : > { %v432_v9 = vpop.permute.xlu0 %431  ;;  %v446_v10 = vpop.permute.xlu1 %445 }
  0xe4   : > { %437 = vst.msk [vmem:[#allocation2 + $0x9] sm:$0xff] %vm435_vm2, %v432_v9  ;;  %451 = vst.msk [vmem:[#allocation2 + $0x21] sm:$0xff] %vm435_vm2, %v446_v10  ;;  %v1080_v9 = vstv %s2176_s2  ;;  %s2586_s2 = smov 2  }
  0xe7   : > { %v2810_v12 = vld [vmem:[#allocation2] sm:$0xff]  ;;  %v458_v13 = vpop.permute.xlu0 %457  ;;  %v460_v14 = vpop.permute.xlu1 %459  ;;  %v2818_v17 = vld [vmem:[#allocation2 + $0x18] sm:$0xff] }
  0xe8   : > { %v580_v15 = vmul.f32 %v579_v11, %v2810_v12  ;;  %464 = vst.msk [vmem:[#allocation2 + $0x31] sm:$0xff] %vm435_vm2, %v458_v13  ;;  %465 = vst.msk [vmem:[#allocation2 + $0x39] sm:$0xff] %vm435_vm2, %v460_v14  ;;  %v593_v21 = vmul.f32 %v592_v16, %v2810_v12  ;;  %v871_v22 = vmul.f32 %v870_v19, %v2818_v17  ;;  %vm1551_vm2 = vcmask 1041408  }
  0xe9   : > { %v884_v29 = vmul.f32 %v883_v25, %v2818_v17  ;;  %v679_v35 = vmul.f32 %v678_v30, %v2810_v12  ;;  %v699_v43 = vmul.f32 %v698_v37, %v2810_v12  ;;  %v792_v51 = vmul.f32 %v791_v45, %v2810_v12 }
  0xea   : > { %584 = vrot.lane.b32.xlu0 %v580_v15, %s2584_s23  ;;  %v812_v61 = vmul.f32 %v811_v52, %v2810_v12  ;;  %v969_v0 = vmul.f32 %v968_v55, %v2818_v17  ;;  %v989_v14 = vmul.f32 %v988_v1, %v2818_v17 }
  0xeb   : > { %v2820_v18 = vld [vmem:[#allocation2 + $0x8] sm:$0xff]  ;;  %v2831_v24 = vld [vmem:[#allocation2 + $0x20] sm:$0xff]  ;;  %v2842_v32 = vld [vmem:[#allocation2 + $0x10] sm:$0x3]  ;;  %v685_v42 = vrot.slane %v679_v35, 1  ;;  %v705_v50 = vrot.slane %v699_v43, 1 }
  0xec   : > { %v581_v20 = vmul.f32 %v579_v11, %v2820_v18  ;;  %v594_v23 = vmul.f32 %v592_v16, %v2820_v18  ;;  %v872_v28 = vmul.f32 %v870_v19, %v2831_v24  ;;  %v680_v31 = vmul.f32 %v678_v30, %v2820_v18  ;;  %v2875_v7 = vld [vmem:[#allocation2 + $0x28] sm:$0x3] }
  0xed   : > { %v885_v36 = vmul.f32 %v883_v25, %v2831_v24  ;;  %v681_v39 = vmul.f32 %v678_v30, %v2842_v32  ;;  %v700_v40 = vmul.f32 %v698_v37, %v2820_v18  ;;  %v701_v44 = vmul.f32 %v698_v37, %v2842_v32 }
  0xee   : > { %586 = vrot.lane.b32.xlu1 %v581_v20, %s2584_s23  ;;  %597 = vrot.lane.b32.xlu0 %v593_v21, %s2585_s26  ;;  %v686_v38 = vrot.slane %v680_v31, 1  ;;  %v793_v49 = vmul.f32 %v791_v45, %v2820_v18  ;;  %v794_v53 = vmul.f32 %v791_v45, %v2842_v32  ;;  %v813_v54 = vmul.f32 %v811_v52, %v2820_v18 }
  0xef   : > { %v2836_v26 = vld [vmem:[#allocation2 + $0x30] sm:$0xff]  ;;  %v2847_v34 = vld [vmem:[#allocation2 + $0x38] sm:$0xff]  ;;  %v688_v47 = vrot.slane %v681_v39, 1  ;;  %v706_v48 = vrot.slane %v700_v40, 1  ;;  %v708_v58 = vrot.slane %v701_v44, 1  ;;  %v798_v60 = vrot.slane %v792_v51, 2 }
  0xf0   : > { %v1160_v33 = vmul.f32 %v1159_v27, %v2836_v26  ;;  %v1161_v41 = vmul.f32 %v1159_v27, %v2847_v34  ;;  %v687_v46 = vsel %vm612_vm3, %v685_v42, %v686_v38  ;;  %v799_v59 = vrot.slane %v793_v49, 2  ;;  %v2908_v51 = vld [vmem:[#allocation2 + $0x40] sm:$0x3] }
  0xf1   : > { %v689_v56 = vsel %vm612_vm3, %v686_v38, %v688_v47  ;;  %v707_v57 = vsel %vm612_vm3, %v705_v50, %v706_v48  ;;  %v801_v62 = vrot.slane %v794_v53, 2  ;;  %v814_v63 = vmul.f32 %v811_v52, %v2842_v32 }
  0xf2   : > { %599 = vrot.lane.b32.xlu1 %v594_v23, %s2585_s26  ;;  %875 = vrot.lane.b32.xlu0 %v871_v22, %s2584_s23  ;;  %v709_v2 = vsel %vm612_vm3, %v706_v48, %v708_v58  ;;  %v800_v3 = vsel %vm725_vm4, %v798_v60, %v799_v59  ;;  %v819_v5 = vrot.slane %v813_v54, 2  ;;  %v970_v6 = vmul.f32 %v968_v55, %v2831_v24 }
  0xf3   : > { %v818_v8 = vrot.slane %v812_v61, 2  ;;  %v802_v10 = vsel %vm725_vm4, %v799_v59, %v801_v62  ;;  %v821_v11 = vrot.slane %v814_v63, 2  ;;  %v975_v13 = vrot.slane %v969_v0, 1 }
  0xf4   : > { %v976_v16 = vrot.slane %v970_v6, 1  ;;  %v971_v19 = vmul.f32 %v968_v55, %v2875_v7  ;;  %v990_v20 = vmul.f32 %v988_v1, %v2831_v24  ;;  %v1100_v21 = vstv %s2177_s10  ;;  %s2160_s10 = sld [smem:[#allocation8 + $0x1b]] }
  0xf5   : > { %v820_v15 = vsel %vm725_vm4, %v818_v8, %v819_v5  ;;  %v822_v22 = vsel %vm725_vm4, %v819_v5, %v821_v11  ;;  %v991_v23 = vmul.f32 %v988_v1, %v2875_v7  ;;  %v1081_v25 = vmul.f32 %v1080_v9, %v2818_v17 }
  0xf6   : > { %877 = vrot.lane.b32.xlu1 %v872_v28, %s2584_s23  ;;  %888 = vrot.lane.b32.xlu0 %v884_v29, %s2585_s26  ;;  %v1082_v27 = vmul.f32 %v1080_v9, %v2831_v24  ;;  %v977_v28 = vsel %vm612_vm3, %v975_v13, %v976_v16  ;;  %v978_v29 = vrot.slane %v971_v19, 1  ;;  %v995_v30 = vrot.slane %v989_v14, 1 }
  0xf7   : > { %v996_v31 = vrot.slane %v990_v20, 1  ;;  %v1087_v35 = vrot.slane %v1081_v25, 2  ;;  %v1101_v37 = vmul.f32 %v1100_v21, %v2818_v17  ;;  %v1083_v40 = vmul.f32 %v1080_v9, %v2875_v7 }
  0xf8   : > { %v979_v38 = vsel %vm612_vm3, %v976_v16, %v978_v29  ;;  %v1103_v43 = vmul.f32 %v1100_v21, %v2875_v7  ;;  %v1257_v48 = vstv %s2182_s16  ;;  %v1172_v50 = vstv %s2894_s19  ;;  %s2187_s16 = sld [smem:[#allocation9 + $0x1]]  ;;  %s2163_s19 = sld [smem:[#allocation8 + $0x1e]] }
  0xf9   : > { %v997_v39 = vsel %vm612_vm3, %v995_v30, %v996_v31  ;;  %v1107_v42 = vrot.slane %v1101_v37, 2  ;;  %v1258_v54 = vmul.f32 %v1257_v48, %v2836_v26  ;;  %v1259_v55 = vmul.f32 %v1257_v48, %v2847_v34  ;;  %v467_v37 = vld [vmem:[%s405_s15 + $0x8] sm:$0xff] }
  0xfa   : > { %890 = vrot.lane.b32.xlu1 %v885_v36, %s2585_s26  ;;  %1164 = vrot.lane.b32.xlu0 %v1160_v33, %s2584_s23  ;;  %v998_v33 = vrot.slane %v991_v23, 1  ;;  %v1088_v36 = vrot.slane %v1082_v27, 2  ;;  %v1110_v49 = vrot.slane %v1103_v43, 2  ;;  %v1173_v58 = vmul.f32 %v1172_v50, %v2836_v26 }
  0xfb   : > { %v1260_v59 = vmul.f32 %v1257_v48, %v2908_v51  ;;  %v1369_v60 = vstv %s2185_s22  ;;  %v1264_v61 = vrot.slane %v1258_v54, 1  ;;  %v1265_v62 = vrot.slane %v1259_v55, 1  ;;  %s2172_s22 = sld [smem:[#allocation8 + $0x27]] }
  0xfc   : > { %v999_v44 = vsel %vm612_vm3, %v996_v31, %v998_v33  ;;  %v1089_v45 = vsel %vm725_vm4, %v1087_v35, %v1088_v36  ;;  %v1174_v1 = vmul.f32 %v1172_v50, %v2847_v34  ;;  %v1370_v5 = vmul.f32 %v1369_v60, %v2836_v26  ;;  %v466_v35 = vld [vmem:[%s405_s15] sm:$0xff]  ;;  %s2123_s15 = sshll.u32 %s2779_s25, 5 }
  0xfd   : > { %v1266_v6 = vsel %vm612_vm3, %v1264_v61, %v1265_v62  ;;  %v1389_v11 = vstv %s2186_s21  ;;  %v1372_v16 = vmul.f32 %v1369_v60, %v2908_v51  ;;  %s2982_s21 = sld [smem:[#allocation8 + $0x24]] }
  0xfe   : > { %1166 = vrot.lane.b32.xlu1 %v1161_v41, %s2584_s23  ;;  %690 = vrot.lane.b32.xlu0 %v687_v46, %s2584_s23  ;;  %v1102_v41 = vmul.f32 %v1100_v21, %v2831_v24  ;;  %v1090_v46 = vrot.slane %v1083_v40, 2  ;;  %v1390_v21 = vmul.f32 %v1389_v11, %v2836_v26  ;;  %v1392_v30 = vmul.f32 %v1389_v11, %v2908_v51 }
  0xff   : > { %v1379_v25 = vrot.slane %v1372_v16, 2 }
 0x100   : > { %v1108_v47 = vrot.slane %v1102_v41, 2  ;;  %v1091_v52 = vsel %vm725_vm4, %v1088_v36, %v1090_v46  ;;  %v1399_v4 = vrot.slane %v1392_v30, 2  ;;  %v574_v41 = vstv %s2160_s10  ;;  %s3022_s10 = scalar_lea.vmem [#allocation11], %s2123_s15  ;;  %s2147_s15 = sld [smem:[#allocation8 + $0xe]] }
 0x101   : > { %v662_v46 = vstv %s2163_s19  ;;  %v952_v30 = vstv %s2172_s22  ;;  %s2137_s19 = sld [smem:[#allocation8 + $0x4]]  ;;  %s2138_s22 = sld [smem:[#allocation8 + $0x5]] }
 0x102   : > { %692 = vrot.lane.b32.xlu1 %v689_v56, %s2584_s23  ;;  %710 = vrot.lane.b32.xlu0 %v707_v57, %s2585_s26  ;;  %v1109_v53 = vsel %vm725_vm4, %v1107_v42, %v1108_v47  ;;  %v1277_v56 = vstv %s2183_s12  ;;  %v1111_v57 = vsel %vm725_vm4, %v1108_v47, %v1110_v49  ;;  %s2166_s12 = sld [smem:[#allocation8 + $0x21]]  ;;  %v664_v49 = vmul.f32 %v662_v46, %v2820_v18 }
 0x103   : > { %v1278_v63 = vmul.f32 %v1277_v56, %v2836_v26  ;;  %v1279_v0 = vmul.f32 %v1277_v56, %v2847_v34 }
 0x105   : > { %v1284_v8 = vrot.slane %v1278_v63, 1  ;;  %v1285_v9 = vrot.slane %v1279_v0, 1 }
 0x106   : > { %712 = vrot.lane.b32.xlu1 %v709_v2, %s2585_s26  ;;  %803 = vrot.lane.b32.xlu0 %v800_v3, %s2584_s23  ;;  %v1267_v2 = vrot.slane %v1260_v59, 1  ;;  %v1280_v3 = vmul.f32 %v1277_v56, %v2908_v51 }
 0x107   : > { %v1286_v19 = vsel %vm612_vm3, %v1284_v8, %v1285_v9 }
 0x108   : > { %v1268_v13 = vsel %vm612_vm3, %v1265_v62, %v1267_v2  ;;  %v1287_v14 = vrot.slane %v1280_v3, 1  ;;  %v775_v61 = vstv %s2166_s12  ;;  %s2135_s12 = sld [smem:[#allocation8 + $0x2]] }
 0x109   : > { %v777_v63 = vmul.f32 %v775_v61, %v2820_v18 }
 0x10a   : > { %805 = vrot.lane.b32.xlu1 %v802_v10, %s2584_s23  ;;  %823 = vrot.lane.b32.xlu0 %v820_v15, %s2585_s26  ;;  %v1371_v10 = vmul.f32 %v1369_v60, %v2847_v34  ;;  %v1376_v15 = vrot.slane %v1370_v5, 2  ;;  %v1288_v23 = vsel %vm612_vm3, %v1285_v9, %v1287_v14 }
 0x10c   : > { %v1377_v20 = vrot.slane %v1371_v10, 2  ;;  %v783_v10 = vrot.slane %v777_v63, 2 }
 0x10e   : > { %825 = vrot.lane.b32.xlu1 %v822_v22, %s2585_s26  ;;  %980 = vrot.lane.b32.xlu0 %v977_v28, %s2584_s23  ;;  %v1391_v22 = vmul.f32 %v1389_v11, %v2847_v34  ;;  %v1378_v27 = vsel %vm725_vm4, %v1376_v15, %v1377_v20  ;;  %v1396_v28 = vrot.slane %v1390_v21, 2  ;;  %v1380_v31 = vsel %vm725_vm4, %v1377_v20, %v1379_v25 }
 0x10f   : > { %v778_v11 = vmul.f32 %v775_v61, %v2842_v32 }
 0x110   : > { %v1397_v29 = vrot.slane %v1391_v22, 2 }
 0x112   : > { %982 = vrot.lane.b32.xlu1 %v979_v38, %s2584_s23  ;;  %1000 = vrot.lane.b32.xlu0 %v997_v39, %s2585_s26  ;;  %v1398_v33 = vsel %vm725_vm4, %v1396_v28, %v1397_v29  ;;  %v1400_v36 = vsel %vm725_vm4, %v1397_v29, %v1399_v4 }
 0x116   : > { %1002 = vrot.lane.b32.xlu1 %v999_v44, %s2585_s26  ;;  %1092 = vrot.lane.b32.xlu0 %v1089_v45, %s2584_s23  ;;  %v575_v44 = vmul.f32 %v574_v41, %v2810_v12  ;;  %v538_v45 = vstv %s2187_s16  ;;  %s2134_s16 = sld [smem:[#allocation8 + $0x1]] }
 0x118   : > { %v577_v50 = vadd.f32 %v575_v44, %v538_v45 }
 0x11a   : > { %1094 = vrot.lane.b32.xlu1 %v1091_v52, %s2584_s23  ;;  %1112 = vrot.lane.b32.xlu0 %v1109_v53, %s2585_s26  ;;  %v576_v52 = vmul.f32 %v574_v41, %v2820_v18  ;;  %v663_v53 = vmul.f32 %v662_v46, %v2810_v12 }
 0x11c   : > { %v578_v59 = vadd.f32 %v576_v52, %v538_v45  ;;  %v669_v62 = vrot.slane %v663_v53, 1  ;;  %v1064_v45 = vstv %s2175_s3  ;;  %v955_v53 = vmul.f32 %v952_v30, %v2875_v7  ;;  %s2141_s3 = sld [smem:[#allocation8 + $0x8]] }
 0x11e   : > { %1114 = vrot.lane.b32.xlu1 %v1111_v57, %s2585_s26  ;;  %1177 = vrot.lane.b32.xlu0 %v1173_v58, %s2585_s26  ;;  %v670_v57 = vrot.slane %v664_v49, 1  ;;  %v665_v58 = vmul.f32 %v662_v46, %v2842_v32 }
 0x120   : > { %v671_v2 = vsel %vm612_vm3, %v669_v62, %v670_v57  ;;  %v672_v5 = vrot.slane %v665_v58, 1 }
 0x122   : > { %1179 = vrot.lane.b32.xlu1 %v1174_v1, %s2585_s26  ;;  %1269 = vrot.lane.b32.xlu0 %v1266_v6, %s2584_s23  ;;  %v776_v6 = vmul.f32 %v775_v61, %v2810_v12  ;;  %v673_v14 = vsel %vm612_vm3, %v670_v57, %v672_v5  ;;  %v785_v12 = vrot.slane %v778_v11, 2 }
 0x126   : > { %1271 = vrot.lane.b32.xlu1 %v1268_v13, %s2584_s23  ;;  %1289 = vrot.lane.b32.xlu0 %v1286_v19, %s2585_s26  ;;  %v782_v19 = vrot.slane %v776_v6, 2 }
 0x128   : > { %v784_v22 = vsel %vm725_vm4, %v782_v19, %v783_v10 }
 0x12a   : > { %1291 = vrot.lane.b32.xlu1 %v1288_v23, %s2585_s26  ;;  %1381 = vrot.lane.b32.xlu0 %v1378_v27, %s2584_s23 }
 0x12e   : > { %1383 = vrot.lane.b32.xlu1 %v1380_v31, %s2584_s23  ;;  %1401 = vrot.lane.b32.xlu0 %v1398_v33, %s2585_s26  ;;  %v786_v31 = vsel %vm725_vm4, %v783_v10, %v785_v12  ;;  %v865_v33 = vstv %s2982_s21  ;;  %s2140_s21 = sld [smem:[#allocation8 + $0x7]] }
 0x12f   : > { %v867_v57 = vmul.f32 %v865_v33, %v2831_v24 }
 0x132   : > { %1403 = vrot.lane.b32.xlu1 %v1400_v36, %s2585_s26  ;;  %470 = vrot.lane.b32.xlu0 %v466_v35, %s2586_s2 }
 0x136   : > { %472 = vrot.lane.b32.xlu1 %v467_v37, %s2586_s2 }
 0x15c   : > { %v585_v38 = vpop.permute.xlu0 %584 }
 0x15d   : > { %v590_v54 = vadd.f32 %v585_v38, %v577_v50  ;;  %v953_v38 = vmul.f32 %v952_v30, %v2818_v17 }
 0x15f   : > { %v959_v49 = vrot.slane %v953_v38, 1 }
 0x160   : > { %v587_v39 = vpop.permute.xlu1 %586  ;;  %v598_v40 = vpop.permute.xlu0 %597 }
 0x161   : > { %v603_v60 = vadd.f32 %v598_v40, %v590_v54  ;;  %v591_v0 = vadd.f32 %v587_v39, %v578_v59  ;;  %v954_v39 = vmul.f32 %v952_v30, %v2831_v24  ;;  %v866_v40 = vmul.f32 %v865_v33, %v2818_v17 }
 0x162   : > { %v1065_v59 = vmul.f32 %v1064_v45, %v2818_v17  ;;  %v1067_v17 = vmul.f32 %v1064_v45, %v2875_v7 }
 0x163   : > { %v676_v9 = vadd.f32 %v671_v2, %v603_v60  ;;  %v960_v50 = vrot.slane %v954_v39, 1  ;;  %v1066_v60 = vmul.f32 %v1064_v45, %v2831_v24 }
 0x164   : > { %v600_v42 = vpop.permute.xlu1 %599  ;;  %v2961_v43 = vpop.permute.xlu0 %875  ;;  %v1071_v6 = vrot.slane %v1065_v59, 2 }
 0x165   : > { %v604_v8 = vadd.f32 %v600_v42, %v591_v0  ;;  %v961_v63 = vsel %vm612_vm3, %v959_v49, %v960_v50  ;;  %v962_v0 = vrot.slane %v955_v53, 1 }
 0x167   : > { %v677_v20 = vadd.f32 %v673_v14, %v604_v8  ;;  %v1072_v8 = vrot.slane %v1066_v60, 2 }
 0x168   : > { %v2964_v47 = vpop.permute.xlu1 %877  ;;  %v2966_v48 = vpop.permute.xlu0 %888 }
 0x16c   : > { %v2971_v55 = vpop.permute.xlu1 %890  ;;  %v2973_v56 = vpop.permute.xlu0 %1164 }
 0x170   : > { %v2977_v1 = vpop.permute.xlu1 %1166  ;;  %v691_v3 = vpop.permute.xlu0 %690 }
 0x171   : > { %v696_v13 = vadd.f32 %v691_v3, %v676_v9 }
 0x174   : > { %v693_v15 = vpop.permute.xlu1 %692  ;;  %v711_v16 = vpop.permute.xlu0 %710 }
 0x175   : > { %v716_v21 = vadd.f32 %v711_v16, %v696_v13  ;;  %v697_v23 = vadd.f32 %v693_v15, %v677_v20  ;;  %v1073_v15 = vsel %vm725_vm4, %v1071_v6, %v1072_v8  ;;  %v1074_v16 = vrot.slane %v1067_v17, 2 }
 0x176   : > { %v1241_v20 = vstv %s2181_s24  ;;  %s3170_s24 = sld [smem:[#allocation8 + $0xa]] }
 0x177   : > { %v789_v25 = vadd.f32 %v784_v22, %v716_v21  ;;  %v1154_v22 = vstv %s2998_s13  ;;  %s2146_s13 = sld [smem:[#allocation8 + $0xd]] }
 0x178   : > { %v713_v27 = vpop.permute.xlu1 %712  ;;  %v804_v28 = vpop.permute.xlu0 %803  ;;  %v1155_v30 = vmul.f32 %v1154_v22, %v2836_v26 }
 0x179   : > { %v717_v29 = vadd.f32 %v713_v27, %v697_v23  ;;  %v809_v4 = vadd.f32 %v804_v28, %v789_v25  ;;  %v1242_v27 = vmul.f32 %v1241_v20, %v2836_v26  ;;  %v1243_v28 = vmul.f32 %v1241_v20, %v2847_v34 }
 0x17b   : > { %v790_v35 = vadd.f32 %v786_v31, %v717_v29  ;;  %v1248_v38 = vrot.slane %v1242_v27, 1  ;;  %v1249_v39 = vrot.slane %v1243_v28, 1 }
 0x17c   : > { %v806_v36 = vpop.permute.xlu1 %805  ;;  %v824_v37 = vpop.permute.xlu0 %823 }
 0x17d   : > { %v829_v41 = vadd.f32 %v824_v37, %v809_v4  ;;  %v810_v42 = vadd.f32 %v806_v36, %v790_v35  ;;  %v1353_v37 = vstv %s2184_s20  ;;  %s3179_s20 = sld [smem:[#allocation8 + $0xb]] }
 0x17e   : > { %v1354_v49 = vmul.f32 %v1353_v37, %v2836_v26 }
 0x17f   : > { %v868_v44 = vadd.f32 %v866_v40, %v829_v41  ;;  %v1244_v40 = vmul.f32 %v1241_v20, %v2908_v51  ;;  %v1156_v41 = vmul.f32 %v1154_v22, %v2847_v34 }
 0x180   : > { %v826_v46 = vpop.permute.xlu1 %825  ;;  %v981_v52 = vpop.permute.xlu0 %980 }
 0x181   : > { %v881_v54 = vadd.f32 %v2961_v43, %v868_v44  ;;  %v830_v58 = vadd.f32 %v826_v46, %v810_v42 }
 0x183   : > { %v869_v61 = vadd.f32 %v867_v57, %v830_v58  ;;  %v894_v62 = vadd.f32 %v2966_v48, %v881_v54  ;;  %v963_v48 = vsel %vm612_vm3, %v960_v50, %v962_v0  ;;  %v1355_v50 = vmul.f32 %v1353_v37, %v2847_v34 }
 0x184   : > { %v983_v2 = vpop.permute.xlu1 %982  ;;  %v1001_v3 = vpop.permute.xlu0 %1000  ;;  %v1250_v54 = vsel %vm612_vm3, %v1248_v38, %v1249_v39  ;;  %v1251_v57 = vrot.slane %v1244_v40, 1 }
 0x185   : > { %v882_v43 = vadd.f32 %v2964_v47, %v869_v61  ;;  %v966_v5 = vadd.f32 %v961_v63, %v894_v62  ;;  %v1360_v62 = vrot.slane %v1354_v49, 2  ;;  %v1361_v63 = vrot.slane %v1355_v50, 2 }
 0x186   : > { %v1252_v26 = vsel %vm612_vm3, %v1249_v39, %v1251_v57 }
 0x187   : > { %v986_v24 = vadd.f32 %v981_v52, %v966_v5  ;;  %v895_v9 = vadd.f32 %v2971_v55, %v882_v43  ;;  %v1075_v55 = vsel %vm725_vm4, %v1072_v8, %v1074_v16  ;;  %v1362_v5 = vsel %vm725_vm4, %v1360_v62, %v1361_v63 }
 0x188   : > { %v1003_v10 = vpop.permute.xlu1 %1002  ;;  %v1093_v11 = vpop.permute.xlu0 %1092 }
 0x189   : > { %v967_v13 = vadd.f32 %v963_v48, %v895_v9  ;;  %v1006_v14 = vadd.f32 %v1001_v3, %v986_v24 }
 0x18b   : > { %v987_v47 = vadd.f32 %v983_v2, %v967_v13  ;;  %v1078_v19 = vadd.f32 %v1073_v15, %v1006_v14 }
 0x18c   : > { %v1095_v21 = vpop.permute.xlu1 %1094  ;;  %v1113_v12 = vpop.permute.xlu0 %1112 }
 0x18d   : > { %v1007_v23 = vadd.f32 %v1003_v10, %v987_v47  ;;  %v1098_v25 = vadd.f32 %v1093_v11, %v1078_v19 }
 0x18f   : > { %v1079_v29 = vadd.f32 %v1075_v55, %v1007_v23  ;;  %v1118_v31 = vadd.f32 %v1113_v12, %v1098_v25 }
 0x190   : > { %v1115_v33 = vpop.permute.xlu1 %1114  ;;  %v1178_v4 = vpop.permute.xlu0 %1177 }
 0x191   : > { %v1099_v35 = vadd.f32 %v1095_v21, %v1079_v29  ;;  %v1157_v36 = vadd.f32 %v1155_v30, %v1118_v31 }
 0x193   : > { %v1119_v42 = vadd.f32 %v1115_v33, %v1099_v35  ;;  %v1170_v44 = vadd.f32 %v2973_v56, %v1157_v36  ;;  %v1356_v56 = vmul.f32 %v1353_v37, %v2908_v51 }
 0x194   : > { %v1180_v45 = vpop.permute.xlu1 %1179  ;;  %v1270_v46 = vpop.permute.xlu0 %1269 }
 0x195   : > { %v1158_v52 = vadd.f32 %v1156_v41, %v1119_v42  ;;  %v1183_v53 = vadd.f32 %v1178_v4, %v1170_v44  ;;  %v1363_v8 = vrot.slane %v1356_v56, 2 }
 0x197   : > { %v1171_v58 = vadd.f32 %v2977_v1, %v1158_v52  ;;  %v1255_v59 = vadd.f32 %v1250_v54, %v1183_v53  ;;  %v1364_v48 = vsel %vm725_vm4, %v1361_v63, %v1363_v8 }
 0x198   : > { %v1272_v60 = vpop.permute.xlu1 %1271  ;;  %v1290_v61 = vpop.permute.xlu0 %1289 }
 0x199   : > { %v1184_v0 = vadd.f32 %v1180_v45, %v1171_v58  ;;  %v1275_v2 = vadd.f32 %v1270_v46, %v1255_v59 }
 0x19b   : > { %v1256_v34 = vadd.f32 %v1252_v26, %v1184_v0  ;;  %v1295_v3 = vadd.f32 %v1290_v61, %v1275_v2 }
 0x19c   : > { %v1292_v43 = vpop.permute.xlu1 %1291  ;;  %v1382_v6 = vpop.permute.xlu0 %1381 }
 0x19d   : > { %v1276_v1 = vadd.f32 %v1272_v60, %v1256_v34  ;;  %v1367_v17 = vadd.f32 %v1362_v5, %v1295_v3 }
 0x19f   : > { %v1296_v24 = vadd.f32 %v1292_v43, %v1276_v1  ;;  %v1387_v9 = vadd.f32 %v1382_v6, %v1367_v17 }
 0x1a0   : > { %v1384_v10 = vpop.permute.xlu1 %1383  ;;  %v1402_v51 = vpop.permute.xlu0 %1401 }
 0x1a1   : > { %v1368_v11 = vadd.f32 %v1364_v48, %v1296_v24  ;;  %v1407_v13 = vadd.f32 %v1402_v51, %v1387_v9 }
 0x1a3   : > { %v1388_v14 = vadd.f32 %v1384_v10, %v1368_v11  ;;  %2188 = vst.msk [vmem:[%s3022_s10 + $0x10] sm:$0xff] %vm1409_vm7, %v1407_v13  ;;  %1417 = vrot.lane.b32.xlu0 %v1407_v13, %s2586_s2 }
 0x1a4   : > { %v1404_v15 = vpop.permute.xlu1 %1403  ;;  %v471_v16 = vpop.permute.xlu0 %470 }
 0x1a5   : > { %v1408_v47 = vadd.f32 %v1404_v15, %v1388_v14  ;;  %478 = vst.msk [vmem:[#allocation3 + $0x1a] sm:$0xff] %vm477_vm8, %v471_v16 }
 0x1a7   : > { %2189 = vst.msk [vmem:[%s3022_s10 + $0x18] sm:$0xff] %vm1409_vm7, %v1408_v47  ;;  %1419 = vrot.lane.b32.xlu1 %v1408_v47, %s2586_s2 }
 0x1a8   : > { %v473_v19 = vpop.permute.xlu1 %472 }
 0x1a9   : > { %479 = vst.msk [vmem:[#allocation3 + $0x22] sm:$0xff] %vm477_vm8, %v473_v19 }
 0x1ac   : > { %v1619_v20 = vld [vmem:[#allocation3 + $0x18] sm:$0xff] }
 0x1ad   : > { %v1622_v21 = vmul.f32 2.0, %v1619_v20  ;;  %v1642_v25 = vrot.slane %v1619_v20, 2 }
 0x1af   : > { %v1628_v23 = vrot.slane %v1622_v21, 1  ;;  %v1425_v21 = vlaneseq }
 0x1b0   : > { %v1620_v22 = vld [vmem:[#allocation3 + $0x20] sm:$0xff]  ;;  %v1621_v12 = vld [vmem:[#allocation3 + $0x28] sm:$0xf] }
 0x1b1   : > { %v1623_v55 = vmul.f32 2.0, %v1620_v22  ;;  %v1624_v27 = vmul.f32 2.0, %v1621_v12  ;;  %v1643_v28 = vrot.slane %v1620_v22, 2  ;;  %v1645_v29 = vrot.slane %v1621_v12, 2 }
 0x1b3   : > { %v1629_v30 = vrot.slane %v1623_v55, 1  ;;  %v1631_v31 = vrot.slane %v1624_v27, 1  ;;  %v1646_v33 = vsel %vm725_vm4, %v1643_v28, %v1645_v29  ;;  %v1644_v36 = vsel %vm725_vm4, %v1642_v25, %v1643_v28 }
 0x1b4   : > { %v1430_v25 = vand.u32 127, %v1425_v21 }
 0x1b5   : > { %v1632_v4 = vsel %vm612_vm3, %v1629_v30, %v1631_v31  ;;  %v1630_v35 = vsel %vm612_vm3, %v1628_v23, %v1629_v30  ;;  %v1638_v37 = vadd.f32 %v1631_v31, %v1621_v12  ;;  %v1426_v23 = vshrl.u32 %v1425_v21, 7 }
 0x1b6   : > { %v1637_v38 = vadd.f32 %v1632_v4, %v1620_v22  ;;  %v1636_v39 = vadd.f32 %v1630_v35, %v1619_v20  ;;  %vm1440_vm10 = vcmp.ge.s32.totalorder %v1430_v25, 1  ;;  %vm1444_vm13 = vcmp.le.s32.totalorder %v1430_v25, 16 }
 0x1b7   : > { %v1652_v40 = vadd.f32 %v1645_v29, %v1638_v37  ;;  %v1428_v27 = vadd.s32 16, %v1426_v23  ;;  %vm1431_vm9 = vcmp.ge.s32.totalorder %v1426_v23, 1  ;;  %vm3109_vm1 = vmand %vm1440_vm10, %vm1444_vm13 }
 0x1b8   : > { %v1651_v41 = vadd.f32 %v1646_v33, %v1637_v38  ;;  %v1650_v42 = vadd.f32 %v1644_v36, %v1636_v39  ;;  %vm1441_vm12 = vmand %vm1431_vm9, %vm1440_vm10 }
 0x1b9   : > { %v3038_v46 = vmul.f32 0.25, %v1652_v40  ;;  %vm1436_vm11 = vcmp.le.s32.totalorder %v1428_v27, 16  ;;  %vm3090_vm15 = vmand %vm1441_vm12, %vm1444_vm13 }
 0x1ba   : > { %v3036_v44 = vmul.f32 0.25, %v1651_v41  ;;  %v1653_v45 = vmul.f32 0.25, %v1650_v42  ;;  %vm1443_vm14 = vmand %vm1436_vm11, %vm1440_vm10 }
 0x1bb   : > { %v1658_v52 = vmul.f32 2.0, %v3038_v46  ;;  %vm3095_vm0 = vmand %vm1443_vm14, %vm1444_vm13 }
 0x1bc   : > { %v1657_v49 = vmul.f32 2.0, %v3036_v44  ;;  %v1656_v50 = vmul.f32 2.0, %v1653_v45 }
 0x1be   : > { %1664 = vrot.lane.b32.xlu0 %v1657_v49, %s2584_s23  ;;  %1662 = vrot.lane.b32.xlu1 %v1656_v50, %s2584_s23 }
 0x1c2   : > { %1666 = vrot.lane.b32.xlu1 %v1658_v52, %s2584_s23 }
 0x1c6   : > { %1677 = vrot.lane.b32.xlu1 %v1653_v45, %s2585_s26 }
 0x215   : > { %v1418_v53 = vpop.permute.xlu0 %1417 }
 0x216   : > { %1423 = vst.msk [vmem:[#allocation3 + $0x2] sm:$0xff] %vm477_vm8, %v1418_v53 }
 0x219   : > { %v1420_v54 = vpop.permute.xlu1 %1419 }
 0x21a   : > { %1424 = vst.msk [vmem:[#allocation3 + $0xa] sm:$0xff] %vm477_vm8, %v1420_v54 }
 0x21d   : > { %v1448_v57 = vld [vmem:[#allocation3] sm:$0xff] }
 0x21e   : > { %v1451_v58 = vmul.f32 2.0, %v1448_v57  ;;  %v1471_v8 = vrot.slane %v1448_v57, 2 }
 0x220   : > { %v1457_v63 = vrot.slane %v1451_v58, 1 }
 0x221   : > { %v1450_v59 = vld [vmem:[#allocation3 + $0x10] sm:$0xf]  ;;  %v1449_v60 = vld [vmem:[#allocation3 + $0x8] sm:$0xff] }
 0x222   : > { %v1453_v61 = vmul.f32 2.0, %v1450_v59  ;;  %v1452_v62 = vmul.f32 2.0, %v1449_v60  ;;  %v1474_v0 = vrot.slane %v1450_v59, 2  ;;  %v1472_v26 = vrot.slane %v1449_v60, 2 }
 0x224   : > { %v1460_v56 = vrot.slane %v1453_v61, 1  ;;  %v1458_v2 = vrot.slane %v1452_v62, 1  ;;  %v1475_v17 = vsel %vm725_vm4, %v1472_v26, %v1474_v0  ;;  %v1473_v9 = vsel %vm725_vm4, %v1471_v8, %v1472_v26 }
 0x226   : > { %v1467_v34 = vadd.f32 %v1460_v56, %v1450_v59  ;;  %v1461_v3 = vsel %vm612_vm3, %v1458_v2, %v1460_v56  ;;  %v1459_v43 = vsel %vm612_vm3, %v1457_v63, %v1458_v2 }
 0x227   : > { %v1466_v5 = vadd.f32 %v1461_v3, %v1449_v60  ;;  %v1465_v6 = vadd.f32 %v1459_v43, %v1448_v57 }
 0x228   : > { %v1481_v1 = vadd.f32 %v1474_v0, %v1467_v34 }
 0x229   : > { %v1480_v24 = vadd.f32 %v1475_v17, %v1466_v5  ;;  %v1479_v10 = vadd.f32 %v1473_v9, %v1465_v6 }
 0x22a   : > { %v3052_v48 = vmul.f32 0.25, %v1481_v1  ;;  %v548_v1 = vstv %s2134_s16  ;;  %s2149_s16 = sld [smem:[#allocation8 + $0x10]] }
 0x22b   : > { %v3054_v51 = vmul.f32 0.25, %v1480_v24  ;;  %v3060_v11 = vmul.f32 0.25, %v1479_v10  ;;  %v550_v17 = vmul.f32 %v548_v1, %v2820_v18  ;;  %v3140_v24 = vld [vmem:[#allocation2] sm:$0xff]  ;;  %v622_v10 = vstv %s2137_s19  ;;  %s2150_s19 = sld [smem:[#allocation8 + $0x11]] }
 0x22c   : > { %1510 = vrot.lane.b32.xlu0 %v3052_v48, %s2585_s26  ;;  %v1487_v14 = vmul.f32 2.0, %v3052_v48  ;;  %v549_v9 = vmul.f32 %v3140_v24, %v548_v1  ;;  %v839_v1 = vstv %s3170_s24  ;;  %s2158_s24 = sld [smem:[#allocation8 + $0x19]] }
 0x22d   : > { %1508 = vrot.lane.b32.xlu1 %v3054_v51, %s2585_s26  ;;  %v1486_v13 = vmul.f32 2.0, %v3054_v51  ;;  %v1485_v15 = vmul.f32 2.0, %v3060_v11 }
 0x230   : > { %1506 = vrot.lane.b32.xlu0 %v3060_v11, %s2585_s26  ;;  %v1663_v16 = vpop.permute.xlu1 %1662  ;;  %v1665_v19 = vpop.permute.xlu0 %1664 }
 0x231   : > { %1493 = vrot.lane.b32.xlu1 %v1486_v13, %s2584_s23  ;;  %v1671_v29 = vadd.f32 %v1663_v16, %v1653_v45  ;;  %v1672_v41 = vadd.f32 %v1665_v19, %v3036_v44  ;;  %v561_v13 = vstv %s2135_s12  ;;  %v625_v16 = vmul.f32 %v622_v10, %v2842_v32  ;;  %s3250_s12 = sld [smem:[#allocation8 + $0x13]] }
 0x232   : > { %v562_v19 = vmul.f32 %v3140_v24, %v561_v13 }
 0x233   : > { %v632_v23 = vrot.slane %v625_v16, 1 }
 0x234   : > { %1495 = vrot.lane.b32.xlu0 %v1487_v14, %s2584_s23  ;;  %v1667_v47 = vpop.permute.xlu1 %1666  ;;  %v3143_v14 = vld [vmem:[#allocation2 + $0x8] sm:$0xff] }
 0x235   : > { %1681 = vrot.lane.b32.xlu1 %v3038_v46, %s2585_s26  ;;  %v1673_v30 = vadd.f32 %v1667_v47, %v3038_v46  ;;  %v623_v47 = vmul.f32 %v3140_v24, %v622_v10  ;;  %v563_v18 = vmul.f32 %v3143_v14, %v561_v13 }
 0x238   : > { %1491 = vrot.lane.b32.xlu0 %v1485_v15, %s2584_s23  ;;  %v1678_v20 = vpop.permute.xlu1 %1677  ;;  %v624_v15 = vmul.f32 %v3143_v14, %v622_v10 }
 0x239   : > { %v1686_v31 = vadd.f32 %v1678_v20, %v1671_v29  ;;  %v642_v20 = vstv %s2138_s22  ;;  %v629_v29 = vrot.slane %v623_v47, 1  ;;  %s2155_s22 = sld [smem:[#allocation8 + $0x16]] }
 0x23a   : > { %v630_v21 = vrot.slane %v624_v15, 1  ;;  %v644_v25 = vmul.f32 %v3143_v14, %v642_v20  ;;  %v645_v27 = vmul.f32 %v642_v20, %v2842_v32  ;;  %v3196_v15 = vld [vmem:[#allocation2 + $0x20] sm:$0xff] }
 0x23b   : > { %v1689_v36 = vmul.f32 0.25, %v1686_v31  ;;  %v735_v31 = vstv %s2140_s21  ;;  %v841_v16 = vmul.f32 %v3196_v15, %v839_v1  ;;  %s2153_s21 = sld [smem:[#allocation8 + $0x14]] }
 0x23c   : > { %1679 = vrot.lane.b32.xlu0 %v3036_v44, %s2585_s26 }
 0x23d   : > { %v3102_v42 = vsel %vm3090_vm15, %v1689_v36, 0.0  ;;  %v633_v36 = vsel %vm612_vm3, %v630_v21, %v632_v23 }
 0x23e   : > { %v1695_v50 = vmul.f32 2.0, %v3102_v42  ;;  %v1713_v56 = vrot.slane %v3102_v42, 2 }
 0x240   : > { %v1701_v59 = vrot.slane %v1695_v50, 1 }
 0x29e   : > { %v3074_v22 = vpop.permute.xlu0 %1510 }
 0x29f   : > { %v3076_v12 = vpop.permute.xlu1 %1508 }
 0x2a2   : > { %v3078_v55 = vpop.permute.xlu0 %1506 }
 0x2a3   : > { %v3080_v28 = vpop.permute.xlu1 %1493 }
 0x2a6   : > { %v3083_v33 = vpop.permute.xlu0 %1495 }
 0x2a7   : > { %v1682_v4 = vpop.permute.xlu1 %1681 }
 0x2a8   : > { %v1688_v35 = vadd.f32 %v1682_v4, %v1673_v30  ;;  %v643_v30 = vmul.f32 %v3140_v24, %v642_v20  ;;  %v737_v4 = vmul.f32 %v3143_v14, %v735_v31 }
 0x2aa   : > { %v3087_v37 = vpop.permute.xlu0 %1491  ;;  %v1691_v39 = vmul.f32 0.25, %v1688_v35  ;;  %v738_v35 = vmul.f32 %v735_v31, %v2842_v32  ;;  %v743_v50 = vrot.slane %v737_v4, 2 }
 0x2ac   : > { %v1694_v46 = vsel %vm3095_vm0, %v1691_v39, 0.0  ;;  %v631_v39 = vsel %vm612_vm3, %v629_v29, %v630_v21  ;;  %v1024_v29 = vstv %s2149_s16  ;;  %s3374_s16 = sld [smem:[#allocation8 + $0x9]] }
 0x2ad   : > { %v1697_v53 = vmul.f32 2.0, %v1694_v46  ;;  %v1716_v0 = vrot.slane %v1694_v46, 2 }
 0x2ae   : > { %v1680_v45 = vpop.permute.xlu0 %1679 }
 0x2af   : > { %v1687_v49 = vadd.f32 %v1680_v45, %v1672_v41  ;;  %v1704_v60 = vrot.slane %v1697_v53, 1  ;;  %v650_v41 = vrot.slane %v644_v25, 1  ;;  %v652_v45 = vrot.slane %v645_v27, 1 }
 0x2b0   : > { %v755_v53 = vstv %s2141_s3  ;;  %s2156_s3 = sld [smem:[#allocation8 + $0x17]] }
 0x2b1   : > { %v1690_v52 = vmul.f32 0.25, %v1687_v49  ;;  %v736_v49 = vmul.f32 %v3140_v24, %v735_v31  ;;  %v3222_v31 = vld [vmem:[#allocation2 + $0x28] sm:$0x3] }
 0x2b3   : > { %v3115_v44 = vsel %vm3109_vm1, %v1690_v52, 0.0  ;;  %v745_v52 = vrot.slane %v738_v35, 2 }
 0x2b4   : > { %v1696_v57 = vmul.f32 2.0, %v3115_v44  ;;  %v1723_v58 = vrot.slane %v3115_v44, 6  ;;  %v1714_v62 = vrot.slane %v3115_v44, 2 }
 0x2b6   : > { %v1702_v61 = vrot.slane %v1696_v57, 1  ;;  %v3122_v63 = vsub.f32 %v1694_v46, %v1723_v58  ;;  %v1717_v43 = vsel %vm725_vm4, %v1714_v62, %v1716_v0  ;;  %v1715_v5 = vsel %vm725_vm4, %v1713_v56, %v1714_v62 }
 0x2b7   : > { %v649_v46 = vrot.slane %v643_v30, 1  ;;  %v653_v57 = vsel %vm612_vm3, %v650_v41, %v652_v45  ;;  %v1502_v62 = vadd.f32 %v3083_v33, %v3052_v48  ;;  %v1500_v56 = vadd.f32 %v3087_v37, %v3060_v11 }
 0x2b8   : > { %v1705_v2 = vsel %vm612_vm3, %v1702_v61, %v1704_v60  ;;  %v1703_v26 = vsel %vm612_vm3, %v1701_v59, %v1702_v61  ;;  %v757_v59 = vmul.f32 %v3143_v14, %v755_v53  ;;  %v3167_v60 = vld [vmem:[#allocation2 + $0x10] sm:$0x3]  ;;  %v742_v0 = vrot.slane %v736_v49, 2 }
 0x2b9   : > { %v1709_v34 = vadd.f32 %v1705_v2, %v3115_v44  ;;  %v1708_v3 = vadd.f32 %v1703_v26, %v3102_v42  ;;  %v651_v32 = vsel %vm612_vm3, %v649_v46, %v650_v41  ;;  %v758_v61 = vmul.f32 %v3167_v60, %v755_v53 }
 0x2ba   : > { %v756_v2 = vmul.f32 %v3140_v24, %v755_v53  ;;  %v1501_v26 = vadd.f32 %v3080_v28, %v3054_v51  ;;  %v744_v48 = vsel %vm725_vm4, %v742_v0, %v743_v50  ;;  %v763_v33 = vrot.slane %v757_v59, 2 }
 0x2bb   : > { %v3131_v6 = vadd.f32 %v1717_v43, %v1709_v34  ;;  %v3133_v8 = vadd.f32 %v1715_v5, %v1708_v3  ;;  %v746_v34 = vsel %vm725_vm4, %v743_v50, %v745_v52  ;;  %v765_v11 = vrot.slane %v758_v61, 2 }
 0x2bc   : > { %v1517_v37 = vadd.f32 %v3074_v22, %v1502_v62  ;;  %v1515_v3 = vadd.f32 %v3078_v55, %v1500_v56  ;;  %v762_v43 = vrot.slane %v756_v2, 2  ;;  %v1516_v5 = vadd.f32 %v3076_v12, %v1501_v26  ;;  %v3199_v12 = vld [vmem:[#allocation2 + $0x18] sm:$0xff] }
 0x2bd   : > { %1735 = vrot.lane.b32.xlu1 %v3131_v6, %s2586_s2  ;;  %1733 = vrot.lane.b32.xlu0 %v3133_v8, %s2586_s2  ;;  %v766_v51 = vsel %vm725_vm4, %v763_v33, %v765_v11  ;;  %v852_v22 = vstv %s3179_s20  ;;  %v932_v55 = vstv %s2147_s15  ;;  %v840_v47 = vmul.f32 %v3199_v12, %v839_v1  ;;  %s534_s20 = sld [smem:[#allocation9]]  ;;  %s2139_s15 = sld [smem:[#allocation8 + $0x6]] }
 0x2be   : > { %v764_v28 = vsel %vm725_vm4, %v762_v43, %v763_v33  ;;  %v1518_v10 = vmul.f32 0.25, %v1515_v3  ;;  %v1519_v13 = vmul.f32 0.25, %v1516_v5  ;;  %v854_v25 = vmul.f32 %v3196_v15, %v852_v22 }
 0x2bf   : > { %v853_v27 = vmul.f32 %v3199_v12, %v852_v22  ;;  %v935_v38 = vmul.f32 %v3222_v31, %v932_v55  ;;  %v933_v4 = vmul.f32 %v3199_v12, %v932_v55  ;;  %v1026_v46 = vmul.f32 %v3196_v15, %v1024_v29 }
 0x2c0   : > { %v3211_v23 = vsel %vm3090_vm15, %v1518_v10, 0.0  ;;  %v3220_v40 = vsel %vm3109_vm1, %v1519_v13, 0.0  ;;  %v1027_v52 = vmul.f32 %v3222_v31, %v1024_v29  ;;  %v1025_v53 = vmul.f32 %v3199_v12, %v1024_v29  ;;  %v3273_v29 = vld [vmem:[#allocation2 + $0x38] sm:$0xff] }
 0x2c1   : > { %555 = vrot.lane.b32.xlu1 %v550_v17, %s2584_s23  ;;  %553 = vrot.lane.b32.xlu0 %v549_v9, %s2584_s23  ;;  %v912_v17 = vstv %s2146_s13  ;;  %v1520_v9 = vmul.f32 0.25, %v1517_v37  ;;  %v1525_v54 = vmul.f32 2.0, %v3220_v40  ;;  %v942_v49 = vrot.slane %v935_v38, 1  ;;  %s2136_s13 = sld [smem:[#allocation8 + $0x3]] }
 0x2c2   : > { %v913_v20 = vmul.f32 %v3199_v12, %v912_v17  ;;  %v939_v50 = vrot.slane %v933_v4, 1  ;;  %v1032_v2 = vrot.slane %v1026_v46, 2  ;;  %v1044_v26 = vstv %s2150_s19  ;;  %s2145_s19 = sld [smem:[#allocation8 + $0xc]] }
 0x2c3   : > { %v3207_v21 = vsel %vm3095_vm0, %v1520_v9, 0.0  ;;  %v1531_v62 = vrot.slane %v1525_v54, 1  ;;  %v1542_v3 = vrot.slane %v3211_v23, 2  ;;  %v1543_v9 = vrot.slane %v3220_v40, 2 }
 0x2c4   : > { %v1526_v35 = vmul.f32 2.0, %v3207_v21  ;;  %v919_v41 = vrot.slane %v913_v20, 1  ;;  %v1545_v37 = vrot.slane %v3207_v21, 2  ;;  %v1045_v10 = vmul.f32 %v3199_v12, %v1044_v26 }
 0x2c5   : > { %568 = vrot.lane.b32.xlu1 %v563_v18, %s2585_s26  ;;  %566 = vrot.lane.b32.xlu0 %v562_v19, %s2585_s26  ;;  %v914_v18 = vmul.f32 %v3196_v15, %v912_v17  ;;  %v915_v19 = vmul.f32 %v912_v17, %v2875_v7  ;;  %v934_v7 = vmul.f32 %v3196_v15, %v932_v55  ;;  %v1128_v20 = vstv %s3250_s12  ;;  %s2148_s12 = sld [smem:[#allocation8 + $0xf]] }
 0x2c6   : > { %v1546_v22 = vsel %vm725_vm4, %v1543_v9, %v1545_v37  ;;  %v1544_v55 = vsel %vm725_vm4, %v1542_v3, %v1543_v9  ;;  %v1141_v38 = vstv %s2153_s21  ;;  %v1221_v4 = vstv %s2156_s3  ;;  %s2154_s21 = sld [smem:[#allocation8 + $0x15]]  ;;  %s2157_s3 = sld [smem:[#allocation8 + $0x18]] }
 0x2c7   : > { %v920_v30 = vrot.slane %v914_v18, 1  ;;  %v940_v45 = vrot.slane %v934_v7, 1  ;;  %v1201_v7 = vstv %s2155_s22  ;;  %v1143_v46 = vmul.f32 %v3273_v29, %v1141_v38  ;;  %s3388_s22 = sld [smem:[#allocation8 + $0x12]] }
 0x2c8   : > { %v1553_v37 = vrot.slane %v3220_v40, 6 }
 0x2c9   : > { %636 = vrot.lane.b32.xlu1 %v633_v36, %s2584_s23  ;;  %634 = vrot.lane.b32.xlu0 %v631_v39, %s2584_s23  ;;  %v1524_v36 = vmul.f32 2.0, %v3211_v23  ;;  %v922_v39 = vrot.slane %v915_v19, 1  ;;  %v921_v59 = vsel %vm612_vm3, %v919_v41, %v920_v30  ;;  %v943_v56 = vsel %vm612_vm3, %v940_v45, %v942_v49  ;;  %v3280_v41 = vld [vmem:[#allocation2 + $0x40] sm:$0x3] }
 0x2ca   : > { %v941_v0 = vsel %vm612_vm3, %v939_v50, %v940_v45  ;;  %v1051_v19 = vrot.slane %v1045_v10, 2  ;;  %v1204_v54 = vmul.f32 %v3280_v41, %v1201_v7  ;;  %v1223_v50 = vmul.f32 %v3273_v29, %v1221_v4 }
 0x2cb   : > { %v1530_v61 = vrot.slane %v1524_v36, 1 }
 0x2cd   : > { %656 = vrot.lane.b32.xlu1 %v653_v57, %s2585_s26  ;;  %654 = vrot.lane.b32.xlu0 %v651_v32, %s2585_s26  ;;  %v1533_v57 = vrot.slane %v1526_v35, 1  ;;  %v923_v32 = vsel %vm612_vm3, %v920_v30, %v922_v39  ;;  %v1532_v11 = vsel %vm612_vm3, %v1530_v61, %v1531_v62  ;;  %v1130_v30 = vmul.f32 %v3273_v29, %v1128_v20  ;;  %v3276_v35 = vld [vmem:[#allocation2 + $0x30] sm:$0xff] }
 0x2ce   : > { %v1537_v5 = vadd.f32 %v1532_v11, %v3211_v23  ;;  %v1129_v36 = vmul.f32 %v3276_v35, %v1128_v20  ;;  %v1203_v39 = vmul.f32 %v3273_v29, %v1201_v7  ;;  %v1202_v45 = vmul.f32 %v3276_v35, %v1201_v7 }
 0x2cf   : > { %v1534_v33 = vsel %vm612_vm3, %v1531_v62, %v1533_v57  ;;  %v1142_v49 = vmul.f32 %v3276_v35, %v1141_v38  ;;  %v1211_v57 = vrot.slane %v1204_v54, 1  ;;  %v1313_v61 = vstv %s2158_s24  ;;  %s2208_s24 = sshll.u32 %s2660_s9, 9 }
 0x2d0   : > { %v1538_v43 = vadd.f32 %v1534_v33, %v3220_v40  ;;  %v1229_v62 = vrot.slane %v1223_v50, 1  ;;  %v1316_v33 = vmul.f32 %v3280_v41, %v1313_v61  ;;  %v1314_v11 = vmul.f32 %v3276_v35, %v1313_v61 }
 0x2d1   : > { %749 = vrot.lane.b32.xlu1 %v746_v34, %s2584_s23  ;;  %747 = vrot.lane.b32.xlu0 %v744_v48, %s2584_s23  ;;  %v1034_v34 = vrot.slane %v1027_v52, 2  ;;  %v1031_v48 = vrot.slane %v1025_v53, 2  ;;  %v1224_v52 = vmul.f32 %v3280_v41, %v1221_v4  ;;  %v1209_v53 = vrot.slane %v1203_v39, 1 }
 0x2d2   : > { %v3260_v13 = vadd.f32 %v1546_v22, %v1538_v43 }
 0x2d3   : > { %v1035_v1 = vsel %vm725_vm4, %v1032_v2, %v1034_v34  ;;  %v1033_v17 = vsel %vm725_vm4, %v1031_v48, %v1032_v2  ;;  %v1231_v2 = vrot.slane %v1224_v52, 1  ;;  %v1552_v34 = vrot.slane %v3211_v23, 6 }
 0x2d4   : > { %v1315_v48 = vmul.f32 %v3273_v29, %v1313_v61 }
 0x2d5   : > { %769 = vrot.lane.b32.xlu1 %v766_v51, %s2585_s26  ;;  %767 = vrot.lane.b32.xlu0 %v764_v28, %s2585_s26  ;;  %v1046_v51 = vmul.f32 %v3196_v15, %v1044_v26  ;;  %v1047_v28 = vmul.f32 %v3222_v31, %v1044_v26  ;;  %v1232_v3 = vsel %vm612_vm3, %v1229_v62, %v1231_v2 }
 0x2d6   : > { %v3312_v10 = vsub.f32 %v3211_v23, %v1552_v34 }
 0x2d7   : > { %v1054_v18 = vrot.slane %v1047_v28, 2  ;;  %v1320_v28 = vrot.slane %v1314_v11, 2 }
 0x2d9   : > { %846 = vrot.lane.b32.xlu1 %v841_v16, %s2584_s23  ;;  %844 = vrot.lane.b32.xlu0 %v840_v47, %s2584_s23  ;;  %v3262_v16 = vadd.f32 %v1544_v55, %v1537_v5  ;;  %v1052_v47 = vrot.slane %v1046_v51, 2  ;;  %v1321_v5 = vrot.slane %v1315_v48, 2  ;;  %v1323_v51 = vrot.slane %v1316_v33, 2 }
 0x2db   : > { %v1324_v22 = vsel %vm725_vm4, %v1321_v5, %v1323_v51  ;;  %v1322_v55 = vsel %vm725_vm4, %v1320_v28, %v1321_v5  ;;  %v718_v5 = vstv %s2139_s15  ;;  %s1788_s15 = scalar_lea.sflag [#allocation6], %s2779_s25 }
 0x2dd   : > { %859 = vrot.lane.b32.xlu1 %v854_v25, %s2585_s26  ;;  %857 = vrot.lane.b32.xlu0 %v853_v27, %s2585_s26  ;;  %v1055_v25 = vsel %vm725_vm4, %v1052_v47, %v1054_v18  ;;  %v1053_v27 = vsel %vm725_vm4, %v1051_v19, %v1052_v47  ;;  %v1571_v19 = vmul.f32 2.0, %v3312_v10 }
 0x2e1   : > { %926 = vrot.lane.b32.xlu1 %v923_v32, %s2584_s23  ;;  %924 = vrot.lane.b32.xlu0 %v921_v59, %s2584_s23  ;;  %v1208_v32 = vrot.slane %v1202_v45, 1  ;;  %v1222_v59 = vmul.f32 %v3276_v35, %v1221_v4 }
 0x2e3   : > { %v1228_v26 = vrot.slane %v1222_v59, 1 }
 0x2e5   : > { %946 = vrot.lane.b32.xlu1 %v943_v56, %s2585_s26  ;;  %944 = vrot.lane.b32.xlu0 %v941_v0, %s2585_s26  ;;  %v1212_v56 = vsel %vm612_vm3, %v1209_v53, %v1211_v57  ;;  %v1210_v0 = vsel %vm612_vm3, %v1208_v32, %v1209_v53  ;;  %v1230_v43 = vsel %vm612_vm3, %v1228_v26, %v1229_v62  ;;  %v605_v53 = vstv %s2136_s13 }
 0x2e6   : > { %v535_v57 = vstv %s534_s20  ;;  %v607_v32 = vmul.f32 %v3143_v14, %v605_v53  ;;  %v608_v59 = vmul.f32 %v3167_v60, %v605_v53  ;;  %s3427_s20 = scalar_lea.hbm %s3704_s4, %s2208_s24 }
 0x2e8   : > { %v614_v2 = vrot.slane %v607_v32, 1  ;;  %v616_v26 = vrot.slane %v608_v59, 1  ;;  %v896_v59 = vstv %s2145_s19  ;;  %s2587_s19 = smov [#allocation11]  }
 0x2e9   : > { %1038 = vrot.lane.b32.xlu1 %v1035_v1, %s2584_s23  ;;  %1036 = vrot.lane.b32.xlu0 %v1033_v17, %s2584_s23  ;;  %v1554_v1 = vsel %vm1551_vm2, %v1552_v34, %v1553_v37  ;;  %v1722_v17 = vrot.slane %v3102_v42, 6  ;;  %v606_v34 = vmul.f32 %v3140_v24, %v605_v53 }
 0x2ea   : > { %v3309_v9 = vsub.f32 %v3220_v40, %v1554_v1  ;;  %v3324_v40 = vsub.f32 %v3207_v21, %v1553_v37  ;;  %v617_v51 = vsel %vm612_vm3, %v614_v2, %v616_v26  ;;  %v720_v1 = vmul.f32 %v3143_v14, %v718_v5 }
 0x2eb   : > { %v3319_v47 = vsub.f32 %v3102_v42, %v1722_v17  ;;  %v1724_v23 = vsel %vm1551_vm2, %v1722_v17, %v1723_v58  ;;  %v1743_v58 = vmul.f32 2.0, %v3122_v63  ;;  %v613_v28 = vrot.slane %v606_v34, 1 }
 0x2ec   : > { %v1572_v18 = vmul.f32 2.0, %v3309_v9  ;;  %v721_v17 = vmul.f32 %v3167_v60, %v718_v5  ;;  %v899_v26 = vmul.f32 %v3222_v31, %v896_v59 }
 0x2ed   : > { %1565 = vrot.lane.b32.xlu1 %v3260_v13, %s2586_s2  ;;  %1563 = vrot.lane.b32.xlu0 %v3262_v16, %s2586_s2  ;;  %s2159_s2 = sld [smem:[#allocation8 + $0x1a]]  ;;  %v1741_v42 = vmul.f32 2.0, %v3319_v47 }
 0x2f1   : > { %1058 = vrot.lane.b32.xlu1 %v1055_v25, %s2585_s26  ;;  %1056 = vrot.lane.b32.xlu0 %v1053_v27, %s2585_s26  ;;  %v3332_v25 = vsub.f32 %v3115_v44, %v1724_v23  ;;  %v1573_v27 = vmul.f32 2.0, %v3324_v40 }
 0x2f3   : > { %v1333_v20 = vstv %s2159_s2  ;;  %v1742_v38 = vmul.f32 2.0, %v3332_v25  ;;  %s3422_s2 = sshll.u32 %s2779_s25, 4 }
 0x2f4   : > { %v1335_v7 = vmul.f32 %v3273_v29, %v1333_v20  ;;  %v1336_v21 = vmul.f32 %v3280_v41, %v1333_v20 }
 0x2f5   : > { %1135 = vrot.lane.b32.xlu1 %v1130_v30, %s2584_s23  ;;  %1133 = vrot.lane.b32.xlu0 %v1129_v36, %s2584_s23  ;;  %v1334_v30 = vmul.f32 %v3276_v35, %v1333_v20  ;;  %v727_v20 = vrot.slane %v720_v1, 2  ;;  %v1008_v1 = vstv %s2148_s12  ;;  %s2385_s12 = sshll.u32 %s2587_s19, 4  ;;  %s2386_s12 = int_to_ptr.vmem [resolvable:$false] %s2385_s12 }
 0x2f6   : > { %v1341_v44 = vrot.slane %v1335_v7, 2  ;;  %v1343_v4 = vrot.slane %v1336_v21, 2 }
 0x2f7   : > { %v1340_v36 = vrot.slane %v1334_v30, 2  ;;  %v719_v30 = vmul.f32 %v3140_v24, %v718_v5 }
 0x2f8   : > { %v1344_v39 = vsel %vm725_vm4, %v1341_v44, %v1343_v4 }
 0x2f9   : > { %1148 = vrot.lane.b32.xlu1 %v1143_v46, %s2585_s26  ;;  %1146 = vrot.lane.b32.xlu0 %v1142_v49, %s2585_s26  ;;  %v1342_v54 = vsel %vm725_vm4, %v1340_v36, %v1341_v44  ;;  %v726_v36 = vrot.slane %v719_v30, 2 }
 0x2fd   : > { %1215 = vrot.lane.b32.xlu1 %v1212_v56, %s2584_s23  ;;  %1213 = vrot.lane.b32.xlu0 %v1210_v0, %s2584_s23 }
 0x301   : > { %1235 = vrot.lane.b32.xlu1 %v1232_v3, %s2585_s26  ;;  %1233 = vrot.lane.b32.xlu0 %v1230_v43, %s2585_s26 }
 0x305   : > { %1327 = vrot.lane.b32.xlu1 %v1324_v22, %s2584_s23  ;;  %1325 = vrot.lane.b32.xlu0 %v1322_v55, %s2584_s23 }
 0x309   : > { %1579 = vrot.lane.b32.xlu1 %v1572_v18, %s2584_s23  ;;  %1577 = vrot.lane.b32.xlu0 %v1571_v19, %s2584_s23  ;;  %v615_v18 = vsel %vm612_vm3, %v613_v28, %v614_v2  ;;  %v898_v2 = vmul.f32 %v3196_v15, %v896_v59  ;;  %v897_v28 = vmul.f32 %v3199_v12, %v896_v59 }
 0x30d   : > { %1747 = vrot.lane.b32.xlu1 %v1741_v42, %s2584_s23  ;;  %1581 = vrot.lane.b32.xlu0 %v1573_v27, %s2584_s23  ;;  %v729_v42 = vrot.slane %v721_v17, 2 }
 0x30f   : > { %v730_v60 = vsel %vm725_vm4, %v727_v20, %v729_v42  ;;  %v1011_v42 = vmul.f32 %v3222_v31, %v1008_v1 }
 0x311   : > { %1751 = vrot.lane.b32.xlu1 %v1743_v58, %s2584_s23  ;;  %1749 = vrot.lane.b32.xlu0 %v1742_v38, %s2584_s23  ;;  %s480_s23 = sld [smem:[#allocation8]] }
 0x315   : > { %1347 = vrot.lane.b32.xlu1 %v1344_v39, %s2585_s26  ;;  %1345 = vrot.lane.b32.xlu0 %v1342_v54, %s2585_s26  ;;  %v728_v54 = vsel %vm725_vm4, %v726_v36, %v727_v20  ;;  %v1010_v20 = vmul.f32 %v3196_v15, %v1008_v1  ;;  %v1009_v36 = vmul.f32 %v3199_v12, %v1008_v1 }
 0x317   : > { %v543_v45 = vstv %s480_s23 }
 0x318   : > { %v545_v50 = vmul.f32 %v3143_v14, %v543_v45  ;;  %v544_v52 = vmul.f32 %v3140_v24, %v543_v45  ;;  %v834_v45 = vstv %s3374_s16 }
 0x319   : > { %1594 = vrot.lane.b32.xlu1 %v3309_v9, %s2585_s26  ;;  %1592 = vrot.lane.b32.xlu0 %v3312_v10, %s2585_s26  ;;  %v836_v24 = vmul.f32 %v3196_v15, %v834_v45 }
 0x31a   : > { %v547_v56 = vadd.f32 %v545_v50, %v535_v57  ;;  %v546_v0 = vadd.f32 %v544_v52, %v535_v57 }
 0x31d   : > { %1762 = vrot.lane.b32.xlu1 %v3319_v47, %s2585_s26  ;;  %1596 = vrot.lane.b32.xlu0 %v3324_v40, %s2585_s26 }
 0x321   : > { %1766 = vrot.lane.b32.xlu1 %v3122_v63, %s2585_s26  ;;  %1764 = vrot.lane.b32.xlu0 %v3332_v25, %s2585_s26 }
 0x32f   : > { %v3361_v46 = vpop.permute.xlu1 %1735  ;;  %v3363_v49 = vpop.permute.xlu0 %1733 }
 0x333   : > { %v556_v61 = vpop.permute.xlu1 %555  ;;  %v554_v62 = vpop.permute.xlu0 %553 }
 0x334   : > { %v560_v48 = vadd.f32 %v556_v61, %v547_v56  ;;  %v559_v33 = vadd.f32 %v554_v62, %v546_v0 }
 0x337   : > { %v569_v11 = vpop.permute.xlu1 %568  ;;  %v567_v37 = vpop.permute.xlu0 %566 }
 0x338   : > { %v573_v3 = vadd.f32 %v569_v11, %v560_v48  ;;  %v572_v43 = vadd.f32 %v567_v37, %v559_v33  ;;  %v835_v33 = vmul.f32 %v3199_v12, %v834_v45  ;;  %v1015_v45 = vrot.slane %v1009_v36, 2 }
 0x339   : > { %v1185_v12 = vstv %s2154_s21 }
 0x33a   : > { %v621_v22 = vadd.f32 %v617_v51, %v573_v3  ;;  %v620_v23 = vadd.f32 %v615_v18, %v572_v43  ;;  %v904_v3 = vrot.slane %v898_v2, 1  ;;  %v906_v43 = vrot.slane %v899_v26, 1 }
 0x33b   : > { %v637_v55 = vpop.permute.xlu1 %636  ;;  %v635_v19 = vpop.permute.xlu0 %634  ;;  %v1740_v2 = vsub.f32 %v3131_v6, %v3361_v46 }
 0x33c   : > { %v641_v27 = vadd.f32 %v637_v55, %v621_v22  ;;  %v640_v58 = vadd.f32 %v635_v19, %v620_v23  ;;  %v907_v17 = vsel %vm612_vm3, %v904_v3, %v906_v43  ;;  %v903_v23 = vrot.slane %v897_v28, 1 }
 0x33f   : > { %v657_v7 = vpop.permute.xlu1 %656  ;;  %v655_v21 = vpop.permute.xlu0 %654 }
 0x340   : > { %v661_v14 = vadd.f32 %v657_v7, %v641_v27  ;;  %v660_v38 = vadd.f32 %v655_v21, %v640_v58  ;;  %v905_v58 = vsel %vm612_vm3, %v903_v23, %v904_v3 }
 0x342   : > { %v734_v44 = vadd.f32 %v730_v60, %v661_v14  ;;  %v733_v52 = vadd.f32 %v728_v54, %v660_v38  ;;  %v1016_v14 = vrot.slane %v1010_v20, 2  ;;  %v1018_v60 = vrot.slane %v1011_v42, 2 }
 0x343   : > { %v750_v4 = vpop.permute.xlu1 %749  ;;  %v748_v39 = vpop.permute.xlu0 %747  ;;  %v1186_v20 = vmul.f32 %v3276_v35, %v1185_v12 }
 0x344   : > { %v754_v50 = vadd.f32 %v750_v4, %v734_v44  ;;  %v753_v61 = vadd.f32 %v748_v39, %v733_v52  ;;  %v1019_v31 = vsel %vm725_vm4, %v1016_v14, %v1018_v60 }
 0x347   : > { %v770_v53 = vpop.permute.xlu1 %769  ;;  %v768_v57 = vpop.permute.xlu0 %767 }
 0x348   : > { %v774_v32 = vadd.f32 %v770_v53, %v754_v50  ;;  %v773_v34 = vadd.f32 %v768_v57, %v753_v61  ;;  %v1017_v61 = vsel %vm725_vm4, %v1015_v45, %v1016_v14 }
 0x34a   : > { %v838_v62 = vadd.f32 %v836_v24, %v774_v32  ;;  %v837_v5 = vadd.f32 %v835_v33, %v773_v34  ;;  %v1123_v24 = vstv %s3388_s22  ;;  %v1187_v34 = vmul.f32 %v3273_v29, %v1185_v12  ;;  %s2387_s22 = scalar_lea.vmem %s2386_s12, 1024 }
 0x34b   : > { %v847_v56 = vpop.permute.xlu1 %846  ;;  %v845_v0 = vpop.permute.xlu0 %844  ;;  %v1124_v28 = vmul.f32 %v3276_v35, %v1123_v24 }
 0x34c   : > { %v851_v48 = vadd.f32 %v847_v56, %v838_v62  ;;  %v850_v18 = vadd.f32 %v845_v0, %v837_v5  ;;  %v1125_v0 = vmul.f32 %v3273_v29, %v1123_v24  ;;  %v1193_v43 = vrot.slane %v1187_v34, 1 }
 0x34f   : > { %v860_v11 = vpop.permute.xlu1 %859  ;;  %v858_v37 = vpop.permute.xlu0 %857 }
 0x350   : > { %v864_v51 = vadd.f32 %v860_v11, %v851_v48  ;;  %v863_v27 = vadd.f32 %v858_v37, %v850_v18  ;;  %v1188_v48 = vmul.f32 %v3280_v41, %v1185_v12 }
 0x352   : > { %v911_v19 = vadd.f32 %v907_v17, %v864_v51  ;;  %v910_v38 = vadd.f32 %v905_v58, %v863_v27  ;;  %v1195_v5 = vrot.slane %v1188_v48, 1  ;;  %v1297_v51 = vstv %s2157_s3 }
 0x353   : > { %v927_v22 = vpop.permute.xlu1 %926  ;;  %v925_v55 = vpop.permute.xlu0 %924  ;;  %v1192_v58 = vrot.slane %v1186_v20, 1 }
 0x354   : > { %v931_v30 = vadd.f32 %v927_v22, %v911_v19  ;;  %v930_v39 = vadd.f32 %v925_v55, %v910_v38  ;;  %v1196_v17 = vsel %vm612_vm3, %v1193_v43, %v1195_v5  ;;  %v1299_v22 = vmul.f32 %v3273_v29, %v1297_v51 }
 0x355   : > { %v1300_v55 = vmul.f32 %v3280_v41, %v1297_v51  ;;  %v1194_v41 = vsel %vm612_vm3, %v1192_v58, %v1193_v43  ;;  %vm1614_vm3 = vcmask 130050  }
 0x356   : > { %v1305_v27 = vrot.slane %v1299_v22, 2 }
 0x357   : > { %v947_v7 = vpop.permute.xlu1 %946  ;;  %v945_v21 = vpop.permute.xlu0 %944 }
 0x358   : > { %v951_v44 = vadd.f32 %v947_v7, %v931_v30  ;;  %v950_v53 = vadd.f32 %v945_v21, %v930_v39  ;;  %v1307_v7 = vrot.slane %v1300_v55, 2  ;;  %v1298_v39 = vmul.f32 %v3276_v35, %v1297_v51 }
 0x35a   : > { %v1023_v54 = vadd.f32 %v1019_v31, %v951_v44 }
 0x35b   : > { %v1039_v4 = vpop.permute.xlu1 %1038  ;;  %v1037_v15 = vpop.permute.xlu0 %1036 }
 0x35c   : > { %v1043_v59 = vadd.f32 %v1039_v4, %v1023_v54  ;;  %v1308_v4 = vsel %vm725_vm4, %v1305_v27, %v1307_v7 }
 0x35f   : > { %v1566_v50 = vpop.permute.xlu1 %1565  ;;  %v1564_v52 = vpop.permute.xlu0 %1563 }
 0x360   : > { %v1570_v57 = vsub.f32 %v3260_v13, %v1566_v50  ;;  %v1569_v32 = vsub.f32 %v3262_v16, %v1564_v52  ;;  %v1739_v13 = vsub.f32 %v3133_v8, %v3363_v49  ;;  %v1022_v16 = vadd.f32 %v1017_v61, %v950_v53 }
 0x361   : > { %v1304_v52 = vrot.slane %v1298_v39, 2 }
 0x362   : > { %1608 = vrot.lane.b32.xlu1 %v1570_v57, %s2585_s26  ;;  %1606 = vrot.lane.b32.xlu0 %v1569_v32, %s2585_s26  ;;  %v1042_v3 = vadd.f32 %v1037_v15, %v1022_v16 }
 0x363   : > { %v1059_v62 = vpop.permute.xlu1 %1058  ;;  %v1057_v56 = vpop.permute.xlu0 %1056  ;;  %v1306_v24 = vsel %vm725_vm4, %v1304_v52, %v1305_v27 }
 0x364   : > { %v1063_v26 = vadd.f32 %v1059_v62, %v1043_v59  ;;  %v1062_v6 = vadd.f32 %v1057_v56, %v1042_v3 }
 0x366   : > { %1778 = vrot.lane.b32.xlu1 %v1740_v2, %s2585_s26  ;;  %1776 = vrot.lane.b32.xlu0 %v1739_v13, %s2585_s26  ;;  %v1127_v33 = vadd.f32 %v1125_v0, %v1063_v26  ;;  %v1126_v18 = vadd.f32 %v1124_v28, %v1062_v6  ;;  %s1821_s26 = sshll.u32 %s3022_s10, 4  ;;  %s3419_s26 = int_to_ptr.vmem [resolvable:$true] %s1821_s26 }
 0x367   : > { %v1136_v11 = vpop.permute.xlu1 %1135  ;;  %v1134_v37 = vpop.permute.xlu0 %1133  ;;  %s2381_s16 = scalar_lea.vmem %s3419_s26, 512  ;;  %p2388_p12 = scmp.lt.s32.totalorder %s3419_s26, %s2386_s12 }
 0x368   : > { %v1140_v46 = vadd.f32 %v1136_v11, %v1127_v33  ;;  %v1139_v21 = vadd.f32 %v1134_v37, %v1126_v18  ;;  %p2382_p2 = scmp.ne.s32.totalorder %s3419_s26, %s2381_s16  ;;  %p2389_p0 = scmp.lt.s32.totalorder %s2387_s22, %s2381_s16 }
 0x36a   : > { %p2383_p10 = pnand %p2382_p2, %p3705_p8  ;;  %p2390_p7 = por %p2389_p0, %p2388_p12 }
 0x36b   : > { %v1149_v8 = vpop.permute.xlu1 %1148  ;;  %v1147_v49 = vpop.permute.xlu0 %1146 }
 0x36c   : > { %v1153_v1 = vadd.f32 %v1149_v8, %v1140_v46  ;;  %v1152_v38 = vadd.f32 %v1147_v49, %v1139_v21  ;;  %p2384_p4 = pneg %p2383_p10 }
 0x36e   : > { %v1200_v19 = vadd.f32 %v1196_v17, %v1153_v1  ;;  %v1199_v31 = vadd.f32 %v1194_v41, %v1152_v38  ;;  %p2391_p11 = pnand %p2390_p7, %p2384_p4 }
 0x36f   : > { %v1216_v23 = vpop.permute.xlu1 %1215  ;;  %v1214_v42 = vpop.permute.xlu0 %1213 }
 0x370   : > { %v1220_v30 = vadd.f32 %v1216_v23, %v1200_v19  ;;  %v1219_v50 = vadd.f32 %v1214_v42, %v1199_v31 }
 0x373   : > { %v1236_v14 = vpop.permute.xlu1 %1235  ;;  %v1234_v60 = vpop.permute.xlu0 %1233 }
 0x374   : > { %v1240_v44 = vadd.f32 %v1236_v14, %v1220_v30  ;;  %v1239_v53 = vadd.f32 %v1234_v60, %v1219_v50 }
 0x376   : > { %v1312_v29 = vadd.f32 %v1308_v4, %v1240_v44  ;;  %v1311_v59 = vadd.f32 %v1306_v24, %v1239_v53 }
 0x377   : > { %v1328_v36 = vpop.permute.xlu1 %1327  ;;  %v1326_v15 = vpop.permute.xlu0 %1325 }
 0x378   : > { %v1332_v35 = vadd.f32 %v1328_v36, %v1312_v29  ;;  %v1331_v62 = vadd.f32 %v1326_v15, %v1311_v59 }
 0x37b   : > { %v1580_v54 = vpop.permute.xlu1 %1579  ;;  %v1578_v45 = vpop.permute.xlu0 %1577 }
 0x37c   : > { %v1587_v16 = vadd.f32 %v1580_v54, %v3309_v9  ;;  %v1586_v26 = vadd.f32 %v1578_v45, %v3312_v10 }
 0x37f   : > { %v1748_v57 = vpop.permute.xlu1 %1747  ;;  %v1582_v32 = vpop.permute.xlu0 %1581 }
 0x383   : > { %v1752_v12 = vpop.permute.xlu1 %1751  ;;  %v1750_v61 = vpop.permute.xlu0 %1749 }
 0x387   : > { %v1348_v56 = vpop.permute.xlu1 %1347  ;;  %v1346_v0 = vpop.permute.xlu0 %1345 }
 0x388   : > { %v1352_v2 = vadd.f32 %v1348_v56, %v1332_v35  ;;  %v1351_v13 = vadd.f32 %v1346_v0, %v1331_v62 }
 0x38a   : > { %1411 = vst.msk [vmem:[%s3022_s10 + $0x8] sm:$0xff] %vm1409_vm7, %v1352_v2  ;;  %1410 = vst.msk [vmem:[%s3022_s10] sm:$0xff] %vm1409_vm7, %v1351_v13 }
 0x38b   : > { %v1595_v34 = vpop.permute.xlu1 %1594  ;;  %v1593_v48 = vpop.permute.xlu0 %1592 }
 0x38c   : > { %2394 = shalt.err (!%p2391_p11)
}
 0x38d   : > { %s2395_s10 = scalar_lea.hbm %s3427_s20, 512  ;;  %s2399_s24 = scalar_lea.hbm %s3704_s4, 1024 }
 0x38e   : > { %p2396_p13 = scmp.ne.s32.totalorder %s3427_s20, %s2395_s10  ;;  %p2400_p9 = scmp.lt.u32.totalorder %s3427_s20, %s3704_s4 }
 0x38f   : > { %p2401_p1 = scmp.lt.u32.totalorder %s2399_s24, %s2395_s10  ;;  %p2403_p2 = scmp.lt.u32.totalorder %s2395_s10, %s3427_s20 }
 0x390   : > { %p2397_p3 = pnand %p2396_p13, %p3705_p8 }
 0x391   : > { %p2402_p5 = por %p2401_p1, %p2400_p9 }
 0x392   : > { %p2398_p6 = pneg %p2397_p3 }
 0x393   : > { %p2404_p10 = por %p2403_p2, %p2402_p5 }
 0x395   : > { %p2405_p4 = pnand %p2404_p10, %p2398_p6 }
 0x397   : > { %2408 = shalt.err (!%p2405_p4)
}
 0x398   : > { %s3670_s16 = smov 128   ;;  %s3672_s19 = smov 8   ;;  %v1602_v9 = vadd.f32 %v1595_v34, %v1587_v16  ;;  %v1601_v10 = vadd.f32 %v1593_v48, %v1586_v26  ;;  %v1756_v33 = vadd.f32 %v1748_v57, %v3319_v47  ;;  %v1588_v11 = vadd.f32 %v1582_v32, %v3324_v40  ;;  %v1763_v37 = vpop.permute.xlu1 %1762  ;;  %v1597_v3 = vpop.permute.xlu0 %1596 }
 0x399   : > { %2226 = dma.vmem_to_hbm [thread:$0]  (%p3705_p8), %s3419_s26, 512, %s3427_s20, %s1788_s15, %s3670_s16, %s3670_s16, %s3672_s19   ;;  %vm1617_vm4 = vcmask 123904   ;;  %v1758_v6 = vadd.f32 %v1752_v12, %v3122_v63  ;;  %v1757_v46 = vadd.f32 %v1750_v61, %v3332_v25 }
 0x39a   : > { %s386_s12 = scalar_lea.vmem [#allocation14], %s3422_s2  ;;  %v1771_v43 = vadd.f32 %v1763_v37, %v1756_v33  ;;  %v1603_v5 = vadd.f32 %v1597_v3, %v1588_v11  ;;  %s3470_s25 = scalar_lea.vmem [#allocation17], %s3422_s2 }
 0x39b   : > { %1616 = vst.msk [vmem:[%s386_s12 + $0x6] sm:$0xff] %vm1409_vm7, %v1602_v9  ;;  %s1853_s26 = sshll.u32 %s386_s12, 4  ;;  %s379_s20 = scalar_lea.vmem [#allocation12], %s3422_s2  ;;  %s3482_s26 = int_to_ptr.vmem [resolvable:$true] %s1853_s26 }
 0x39c   : > { %1615 = vst.msk [vmem:[%s386_s12 - $0x2] sm:$0xfc] %vm1614_vm3, %v1601_v10  ;;  %1784 = vst.msk [vmem:[%s3470_s25 - $0x2] sm:$0xfc] %vm1614_vm3, %v1771_v43  ;;  %v1767_v47 = vpop.permute.xlu1 %1766  ;;  %v1765_v40 = vpop.permute.xlu0 %1764  ;;  %s1837_s15 = sshll.u32 %s379_s20, 4  ;;  %s3674_s22 = sand.u32 1, %s2660_s9   ;;  %s3489_s15 = int_to_ptr.vmem [resolvable:$true] %s1837_s15 }
 0x39d   : > { %1618 = vst.msk [vmem:[%s386_s12 + $0xe] sm:$0x3] %vm1617_vm4, %v1603_v5  ;;  %v1773_v51 = vadd.f32 %v1767_v47, %v1758_v6  ;;  %v1772_v8 = vadd.f32 %v1765_v40, %v1757_v46  ;;  %s3480_s10 = sshll.u32 %s2660_s9, 8  ;;  %s3485_s21 = scalar_lea.vmem [#allocation15], %s3422_s2 }
 0x39e   : > { %s1869_s3 = sshll.u32 %s3485_s21, 4  ;;  %s3495_s12 = scalar_lea.hbm %s3660_s5, %s3480_s10  ;;  %s3497_s3 = int_to_ptr.vmem [resolvable:$true] %s1869_s3 }
 0x39f   : > { %1786 = vst.msk [vmem:[%s3470_s25 + $0xe] sm:$0x3] %vm1617_vm4, %v1773_v51  ;;  %s3503_s19 = scalar_lea.hbm %s3661_s6, %s3480_s10  ;;  %s3511_s13 = scalar_lea.hbm %s3662_s7, %s3480_s10 }
 0x3a0   : > { %1785 = vst.msk [vmem:[%s3470_s25 + $0x6] sm:$0xff] %vm1409_vm7, %v1772_v8  ;;  %s3515_s0 = scalar_lea.sflag [#allocation13], %s3674_s22  ;;  %s2409_s1 = scalar_lea.vmem %s3489_s15, 256 }
 0x3a1   : > { %p2410_p12 = scmp.ne.s32.totalorder %s3489_s15, %s2409_s1  ;;  %s2590_s16 = smov [#allocation12]  }
 0x3a2   : > { %s2413_s2 = sshll.u32 %s2590_s16, 4  ;;  %s2414_s2 = int_to_ptr.vmem [resolvable:$false] %s2413_s2 }
 0x3a3   : > { %p2411_p0 = pnand %p2410_p12, %p3705_p8  ;;  %s2415_s4 = scalar_lea.vmem %s2414_s2, 512 }
 0x3a4   : > { %p2416_p11 = scmp.lt.s32.totalorder %s3489_s15, %s2414_s2  ;;  %p2417_p13 = scmp.lt.s32.totalorder %s2415_s4, %s2409_s1 }
 0x3a5   : > { %p2412_p7 = pneg %p2411_p0 }
 0x3a6   : > { %p2418_p3 = por %p2417_p13, %p2416_p11 }
 0x3a8   : > { %p2419_p6 = pnand %p2418_p3, %p2412_p7 }
 0x3d4   : > { %v1609_v63 = vpop.permute.xlu1 %1608  ;;  %v1607_v25 = vpop.permute.xlu0 %1606 }
 0x3d5   : > { %1613 = vst.msk [vmem:[%s379_s20 + $0x8] sm:$0xff] %vm1409_vm7, %v1609_v63  ;;  %1612 = vst.msk [vmem:[%s379_s20] sm:$0xff] %vm1409_vm7, %v1607_v25 }
 0x3d6   : > { %2422 = shalt.err (!%p2419_p6)
}
 0x3d7   : > { %s2423_s20 = scalar_lea.hbm %s3495_s12, 256  ;;  %s2427_s16 = scalar_lea.hbm %s3660_s5, 512 }
 0x3d8   : > { %p2424_p9 = scmp.ne.s32.totalorder %s3495_s12, %s2423_s20  ;;  %p2428_p2 = scmp.lt.u32.totalorder %s3495_s12, %s3660_s5 }
 0x3d9   : > { %p2429_p10 = scmp.lt.u32.totalorder %s2427_s16, %s2423_s20  ;;  %p2431_p12 = scmp.lt.u32.totalorder %s2423_s20, %s3495_s12 }
 0x3da   : > { %p2425_p1 = pnand %p2424_p9, %p3705_p8 }
 0x3db   : > { %p2430_p4 = por %p2429_p10, %p2428_p2 }
 0x3dc   : > { %p2426_p5 = pneg %p2425_p1 }
 0x3dd   : > { %p2432_p0 = por %p2431_p12, %p2430_p4 }
 0x3df   : > { %p2433_p7 = pnand %p2432_p0, %p2426_p5 }
 0x3e1   : > { %2436 = shalt.err (!%p2433_p7)
}
 0x3e2   : > { %s3706_s1 = smov 8   ;;  %s3707_s4 = smov 128  }
 0x3e3   : > { %2227 = dma.vmem_to_hbm [thread:$0]  (%p3705_p8), %s3489_s15, 256, %s3495_s12, %s3515_s0, %s3707_s4, %s3707_s4, %s3706_s1  }
 0x3e4   : > { %s2437_s22 = scalar_lea.vmem %s3482_s26, 256  ;;  %s2591_s20 = smov [#allocation14]  }
 0x3e5   : > { %p2438_p11 = scmp.ne.s32.totalorder %s3482_s26, %s2437_s22  ;;  %s2441_s24 = sshll.u32 %s2591_s20, 4  ;;  %s2442_s24 = int_to_ptr.vmem [resolvable:$false] %s2441_s24 }
 0x3e6   : > { %s2443_s23 = scalar_lea.vmem %s2442_s24, 512  ;;  %p2444_p6 = scmp.lt.s32.totalorder %s3482_s26, %s2442_s24 }
 0x3e7   : > { %p2439_p13 = pnand %p2438_p11, %p3705_p8  ;;  %p2445_p9 = scmp.lt.s32.totalorder %s2443_s23, %s2437_s22 }
 0x3e9   : > { %p2440_p3 = pneg %p2439_p13  ;;  %p2446_p1 = por %p2445_p9, %p2444_p6 }
 0x3eb   : > { %p2447_p5 = pnand %p2446_p1, %p2440_p3 }
 0x3ed   : > { %2450 = shalt.err (!%p2447_p5)
}
 0x3ee   : > { %s2451_s15 = scalar_lea.hbm %s3503_s19, 256  ;;  %s2455_s2 = scalar_lea.hbm %s3661_s6, 512 }
 0x3ef   : > { %p2452_p2 = scmp.ne.s32.totalorder %s3503_s19, %s2451_s15  ;;  %p2456_p12 = scmp.lt.u32.totalorder %s3503_s19, %s3661_s6 }
 0x3f0   : > { %p2457_p0 = scmp.lt.u32.totalorder %s2455_s2, %s2451_s15  ;;  %p2459_p11 = scmp.lt.u32.totalorder %s2451_s15, %s3503_s19 }
 0x3f1   : > { %p2453_p10 = pnand %p2452_p2, %p3705_p8 }
 0x3f2   : > { %p2458_p7 = por %p2457_p0, %p2456_p12 }
 0x3f3   : > { %p2454_p4 = pneg %p2453_p10 }
 0x3f4   : > { %p2460_p13 = por %p2459_p11, %p2458_p7 }
 0x3f6   : > { %p2461_p3 = pnand %p2460_p13, %p2454_p4 }
 0x3f8   : > { %2464 = shalt.err (!%p2461_p3)
}
 0x3f9   : > { %2228 = dma.vmem_to_hbm [thread:$0]  (%p3705_p8), %s3482_s26, 256, %s3503_s19, %s3515_s0, %s3707_s4, %s3707_s4, %s3706_s1   ;;  %v1779_v49 = vpop.permute.xlu1 %1778  ;;  %v1777_v28 = vpop.permute.xlu0 %1776 }
 0x3fa   : > { %s3708_s22 = sshll.u32 %s3470_s25, 4  ;;  %s3575_s12 = scalar_lea.hbm %s3663_s8, %s3480_s10  ;;  %1783 = vst.msk [vmem:[%s3485_s21 + $0x8] sm:$0xff] %vm1409_vm7, %v1779_v49  ;;  %1782 = vst.msk [vmem:[%s3485_s21] sm:$0xff] %vm1409_vm7, %v1777_v28  ;;  %s3569_s22 = int_to_ptr.vmem [resolvable:$true] %s3708_s22 }
 0x3fb   : > { %s3709_s16 = sand.u32 1, %s2660_s9   ;;  %s2465_s20 = scalar_lea.vmem %s3497_s3, 256 }
 0x3fc   : > { %s3583_s2 = scalar_lea.sflag [#allocation16], %s3709_s16  ;;  %p2466_p6 = scmp.ne.s32.totalorder %s3497_s3, %s2465_s20 }
 0x3fd   : > { %s2592_s0 = smov [#allocation15]  }
 0x3fe   : > { %p2467_p9 = pnand %p2466_p6, %p3705_p8  ;;  %s2469_s19 = sshll.u32 %s2592_s0, 4  ;;  %s2470_s19 = int_to_ptr.vmem [resolvable:$false] %s2469_s19 }
 0x3ff   : > { %s2471_s25 = scalar_lea.vmem %s2470_s19, 512  ;;  %p2472_p5 = scmp.lt.s32.totalorder %s3497_s3, %s2470_s19 }
 0x400   : > { %p2468_p1 = pneg %p2467_p9  ;;  %p2473_p2 = scmp.lt.s32.totalorder %s2471_s25, %s2465_s20 }
 0x402   : > { %p2474_p10 = por %p2473_p2, %p2472_p5 }
 0x404   : > { %p2475_p4 = pnand %p2474_p10, %p2468_p1 }
 0x406   : > { %2478 = shalt.err (!%p2475_p4)
}
 0x407   : > { %s2479_s9 = scalar_lea.hbm %s3511_s13, 256  ;;  %s2483_s21 = scalar_lea.hbm %s3662_s7, 512 }
 0x408   : > { %p2480_p12 = scmp.ne.s32.totalorder %s3511_s13, %s2479_s9  ;;  %p2484_p11 = scmp.lt.u32.totalorder %s3511_s13, %s3662_s7 }
 0x409   : > { %p2485_p13 = scmp.lt.u32.totalorder %s2483_s21, %s2479_s9  ;;  %p2487_p6 = scmp.lt.u32.totalorder %s2479_s9, %s3511_s13 }
 0x40a   : > { %p2481_p0 = pnand %p2480_p12, %p3705_p8 }
 0x40b   : > { %p2486_p3 = por %p2485_p13, %p2484_p11 }
 0x40c   : > { %p2482_p7 = pneg %p2481_p0 }
 0x40d   : > { %p2488_p9 = por %p2487_p6, %p2486_p3 }
 0x40f   : > { %p2489_p1 = pnand %p2488_p9, %p2482_p7 }
 0x411   : > { %2492 = shalt.err (!%p2489_p1)
}
 0x412   : > { %2229 = dma.vmem_to_hbm [thread:$0]  (%p3705_p8), %s3497_s3, 256, %s3511_s13, %s3583_s2, %s3707_s4, %s3707_s4, %s3706_s1  }
 0x413   : > { %s2493_s15 = scalar_lea.vmem %s3569_s22, 256  ;;  %s2593_s16 = smov [#allocation17]  }
 0x414   : > { %p2494_p5 = scmp.ne.s32.totalorder %s3569_s22, %s2493_s15  ;;  %s2497_s20 = sshll.u32 %s2593_s16, 4  ;;  %s2498_s20 = int_to_ptr.vmem [resolvable:$false] %s2497_s20 }
 0x415   : > { %s2499_s0 = scalar_lea.vmem %s2498_s20, 512  ;;  %p2500_p4 = scmp.lt.s32.totalorder %s3569_s22, %s2498_s20 }
 0x416   : > { %p2495_p2 = pnand %p2494_p5, %p3705_p8  ;;  %p2501_p12 = scmp.lt.s32.totalorder %s2499_s0, %s2493_s15 }
 0x418   : > { %p2496_p10 = pneg %p2495_p2  ;;  %p2502_p0 = por %p2501_p12, %p2500_p4 }
 0x41a   : > { %p2503_p7 = pnand %p2502_p0, %p2496_p10 }
 0x41c   : > { %2506 = shalt.err (!%p2503_p7)
}
 0x41d   : > { %s2507_s3 = scalar_lea.hbm %s3575_s12, 256  ;;  %s2511_s25 = scalar_lea.hbm %s3663_s8, 512 }
 0x41e   : > { %p2508_p11 = scmp.ne.s32.totalorder %s3575_s12, %s2507_s3  ;;  %p2512_p6 = scmp.lt.u32.totalorder %s3575_s12, %s3663_s8 }
 0x41f   : > { %p2513_p9 = scmp.lt.u32.totalorder %s2511_s25, %s2507_s3  ;;  %p2515_p5 = scmp.lt.u32.totalorder %s2507_s3, %s3575_s12 }
 0x420   : > { %p2509_p13 = pnand %p2508_p11, %p3705_p8 }
 0x421   : > { %p2514_p1 = por %p2513_p9, %p2512_p6 }
 0x422   : > { %p2510_p3 = pneg %p2509_p13 }
 0x423   : > { %p2516_p2 = por %p2515_p5, %p2514_p1 }
 0x425   : > { %p2517_p10 = pnand %p2516_p2, %p2510_p3 }
 0x427   : > { %2520 = shalt.err (!%p2517_p10)
}
 0x428   : > { %2230 = dma.vmem_to_hbm [thread:$0]  (%p3705_p8), %s3569_s22, 256, %s3575_s12, %s3583_s2, %s3707_s4, %s3707_s4, %s3706_s1  }
 0x429 PF: > { %s1900_s10 = sand.u32 1, %s2563_s27   ;;  %p3710_p4 = scmp.ne.s32.totalorder %s3683_s18, 0 }
 0x42a   : > { %p3711_p12 = scmp.ge.s32.totalorder %s2575_s30, 2  ;;  %s1901_s21 = scalar_lea.sflag [#allocation6], %s1900_s10 }
 0x42c   : > { %p2248_p0 = pnand %p3711_p12, %p3710_p4 }
 0x42e   : > { %2550 = dma.done.wait (!%p2248_p0), %s1901_s21, 512  }
 0x42f   : > { %2552 = vsyncadd (!%p2248_p0), %s1901_s21, 4294966784  ;;  %s3712_s17 = sadd.s32 4294967294, %s2575_s30  }
 0x430   : > { %s1909_s24 = sand.u32 1, %s3712_s17  }
 0x431   : > { %s1910_s23 = scalar_lea.sflag [#allocation13], %s1909_s24 }
 0x432   : > { %2554 = dma.done.wait (!%p2248_p0), %s1910_s23, 512  }
 0x433   : > { %2556 = vsyncadd (!%p2248_p0), %s1910_s23, 4294966784  ;;  %s1928_s15 = scalar_lea.sflag [#allocation16], %s1909_s24 }
 0x434   : > { %2558 = dma.done.wait (!%p2248_p0), %s1928_s15, 512  }
 0x435   : > { %2560 = vsyncadd (!%p2248_p0), %s1928_s15, 4294966784  ;;  %p30_p8 = scmp.ge.s32.totalorder %s2664_s11, 4   ;;  %s3713_s27 = smov %s2567_s28 }
 0x436   : > { %s3714_s28 = smov %s2571_s29  ;;  %s3715_s29 = smov %s2676_s14 }
 0x437   : > { %s3716_s30 = smov %s2664_s11  ;;  %32 = sbr.rel (!%p30_p8) target bundleno = 17 (0x11), region = 163 }
 0x43e   :  { %1942 = vsyncpa [#allocation5], 1 }
 0x43f   :  { %1944 = vsyncpa [#allocation5 + $0x1], 1 }
 0x440   :  { %1945 = vsyncpa [#allocation6], 1 }
 0x441   :  { %1947 = vsyncpa [#allocation6 + $0x1], 1 }
 0x442   :  { %1948 = vsyncpa [#allocation13], 1 }
 0x443   :  { %1950 = vsyncpa [#allocation13 + $0x1], 1 }
 0x444   :  { %1951 = vsyncpa [#allocation16], 1 }
 0x445   :  { %1953 = vsyncpa [#allocation16 + $0x1], 1 }
 0x446   :  { %1954 = vsyncpa [#allocation7], 1 }
 0x447   :  { %1956 = vsyncpa [#allocation7 + $0x1], 1 }
 0x448   :  { %1957 = vsyncpa [#allocation10], 1 }

</bundles_post_ra>
